<compile_context>
chip_gen: v6e
topology: v6e:2x2x1
jax: 0.10.0
libtpu: 0.0.40
codegen_flags: <defaults>
</compile_context>

<pallas_src>
import math

import jax
import jax.numpy as jnp
from jax import lax
from jax.experimental import pallas as pl
from jax.experimental.pallas import tpu as pltpu

# ---- Config (the PyTorch snippet references an external `Config`) ----
D_MODEL = 32
N_HEADS = 4
D_FFN = 64
D_HEAD = D_MODEL // N_HEADS
LN_EPS = 1e-5

# ---- Packed bf16 weight-slab row layout (all column slices start at 0) ----
_W_COLS = 3 * D_MODEL                  # 96 (widest operand: fused QKV)
_R_QKV = 0                             # (D_MODEL, 3*D_MODEL)
_R_WO = _R_QKV + D_MODEL               # (D_MODEL, D_MODEL)
_R_W1 = _R_WO + D_MODEL                # (D_MODEL, D_FFN)
_R_W2 = _R_W1 + D_MODEL                # (D_FFN,  D_MODEL)
_W_ROWS = _R_W2 + D_FFN                # 160
# f32 vector-slab rows: 0 ln1_g, 1 ln1_b, 2 ln2_g, 3 ln2_b, 4 bqkv, 5 bo,
#                       6 ffn_b1, 7 ffn_b2   -> shape (8, 96)


# ============================ Fused Pallas kernel ============================

def _ln(x, g, b):
    mu = jnp.mean(x, axis=-1, keepdims=True)
    var = jnp.mean((x - mu) ** 2, axis=-1, keepdims=True)
    return (x - mu) * lax.rsqrt(var + LN_EPS) * g + b


def _encoder_layer_kernel(x_ref, bias_ref, w_ref, v_ref, o_ref):
    S = bias_ref.shape[-1]
    BB = bias_ref.shape[0]             # batch elements handled by this step
    bf16 = jnp.bfloat16

    x = x_ref[...]                     # (BB*S, D) f32

    # ---- carve packed operand slabs (static, tile-aligned slices) ----------
    vecs = v_ref[...]                  # (8, 96) f32
    ln1_g, ln1_b = vecs[0:1, :D_MODEL], vecs[1:2, :D_MODEL]
    ln2_g, ln2_b = vecs[2:3, :D_MODEL], vecs[3:4, :D_MODEL]
    bqkv = vecs[4:5, :3 * D_MODEL]
    bo = vecs[5:6, :D_MODEL]
    b1 = vecs[6:7, :D_FFN]
    b2 = vecs[7:8, :D_MODEL]

    wqkv = w_ref[_R_QKV:_R_QKV + D_MODEL, :]           # (D, 3D) bf16
    wo = w_ref[_R_WO:_R_WO + D_MODEL, :D_MODEL]        # (D, D)  bf16
    w1 = w_ref[_R_W1:_R_W1 + D_MODEL, :D_FFN]          # (D, F)  bf16
    w2 = w_ref[_R_W2:_R_W2 + D_FFN, :D_MODEL]          # (F, D)  bf16

    # ---- LayerNorm 1 + fused QKV projection (softmax scale folded into Q) --
    y = _ln(x, ln1_g, ln1_b)
    qkv = jnp.dot(y.astype(bf16), wqkv,
                  preferred_element_type=jnp.float32) + bqkv        # (BB*S, 3D)

    # ---- multi-head attention (batch x head statically unrolled) -----------
    z_rows = []
    for b in range(BB):
        r0 = b * S
        bias_b = bias_ref[b]           # (S, S) additive mask: 0 / -1e9
        q_b = qkv[r0:r0 + S, 0:D_MODEL]
        k_b = qkv[r0:r0 + S, D_MODEL:2 * D_MODEL]
        v_b = qkv[r0:r0 + S, 2 * D_MODEL:3 * D_MODEL]
        z_heads = []
        for h in range(N_HEADS):
            lo = h * D_HEAD
            q_h = q_b[:, lo:lo + D_HEAD].astype(bf16)
            k_h = k_b[:, lo:lo + D_HEAD].astype(bf16)
            v_h = v_b[:, lo:lo + D_HEAD].astype(bf16)
            s = lax.dot_general(q_h, k_h, (((1,), (1,)), ((), ())),
                                preferred_element_type=jnp.float32) + bias_b
            s = s - jnp.max(s, axis=-1, keepdims=True)
            p = jnp.exp(s)
            p = p * pl.reciprocal(jnp.sum(p, axis=-1, keepdims=True),
                                  approx=True)
            z_heads.append(jnp.dot(p.astype(bf16), v_h,
                                   preferred_element_type=jnp.float32))
        z_rows.append(jnp.concatenate(z_heads, axis=-1))             # (S, D)
    z = z_rows[0] if BB == 1 else jnp.concatenate(z_rows, axis=0)    # (BB*S, D)

    # ---- single fused output projection + residual --------------------------
    att = jnp.dot(z.astype(bf16), wo, preferred_element_type=jnp.float32) + bo
    x1 = x + att                       # dropout == identity (eval mode)

    # ---- LayerNorm 2 + FFN + residual ---------------------------------------
    y2 = _ln(x1, ln2_g, ln2_b)
    h1 = jnp.maximum(
        jnp.dot(y2.astype(bf16), w1, preferred_element_type=jnp.float32) + b1,
        0.0)
    ffn = jnp.dot(h1.astype(bf16), w2, preferred_element_type=jnp.float32) + b2

    o_ref[...] = x1 + ffn              # single lane-dense f32 store


# ============================ Wrapper ============================

def _batch_block_size(batch):
    kind = ""
    try:
        kind = jax.devices()[0].device_kind.lower()
    except Exception:
        pass
    # v7x: 2 TensorCores/chip -> keep one batch element per grid step so the
    # "parallel" grid axis shards batch across cores.  Single-TC v5e/v6e: fold
    # the whole batch into one grid step (per-step overhead ~0.35 us).
    if batch > 1 and "v7" in kind:
        return 1
    return batch


def _pack_params(params):
    scale = jnp.float32(1.0 / math.sqrt(D_HEAD))
    # Fuse Q/K/V weights into one (D, 3D) matmul; fold softmax scale into Q.
    wqkv = jnp.concatenate(
        [params["wq"] * scale, params["wk"], params["wv"]], axis=1)   # (D, 3D)
    bqkv = jnp.concatenate([params["bq"] * scale, params["bk"], params["bv"]])

    def pad_mat(m):
        return jnp.pad(m, ((0, 0), (0, _W_COLS - m.shape[1])))

    w_slab = jnp.concatenate(
        [wqkv, pad_mat(params["wo"]), pad_mat(params["ffn_w1"]),
         pad_mat(params["ffn_w2"])], axis=0).astype(jnp.bfloat16)     # (160, 96)

    def row(v):
        return jnp.pad(v, (0, _W_COLS - v.shape[0]))[None, :]

    v_slab = jnp.concatenate(
        [row(params["ln1_g"]), row(params["ln1_b"]),
         row(params["ln2_g"]), row(params["ln2_b"]),
         row(bqkv), row(params["bo"]),
         row(params["ffn_b1"]), row(params["ffn_b2"])],
        axis=0).astype(jnp.float32)                                   # (8, 96)
    return w_slab, v_slab


def encoder_layer(x, mask_bool, params):
    """x: (B, S, D_MODEL) f32, mask_bool: (B, S, S) bool (True = masked)."""
    B, S, D = x.shape
    assert D == D_MODEL

    w_slab, v_slab = _pack_params(params)
    # Additive attention bias computed once in the wrapper.
    bias = jnp.where(mask_bool, jnp.float32(-1e9), jnp.float32(0.0))  # (B, S, S)
    # TODO(synk): for long sequences generate the bias in-kernel from lengths
    # (scalar prefetch + iota) and KV-tile the attention flash-style instead of
    # materializing (B,S,S) / (S,S) scores.

    bb = _batch_block_size(B)
    grid = (B // bb,)
    x_flat = x.reshape(B * S, D)

    out_flat = pl.pallas_call(
        _encoder_layer_kernel,
        out_shape=jax.ShapeDtypeStruct((B * S, D), jnp.float32),
        grid=grid,
        in_specs=[
            pl.BlockSpec((bb * S, D), lambda i: (i, 0)),       # x (flattened)
            pl.BlockSpec((bb, S, S), lambda i: (i, 0, 0)),     # additive mask
            pl.BlockSpec(w_slab.shape, lambda i: (0, 0)),      # bf16 weight slab
            pl.BlockSpec(v_slab.shape, lambda i: (0, 0)),      # f32 bias/LN slab
        ],
        out_specs=pl.BlockSpec((bb * S, D), lambda i: (i, 0)),
        compiler_params=pltpu.CompilerParams(
            dimension_semantics=("parallel",)),
    )(x_flat, bias, w_slab, v_slab)
    return out_flat.reshape(B, S, D)


# ============================ Pure-JAX reference ============================

def ref_layernorm(x, g, b):
    mu = jnp.mean(x, axis=-1, keepdims=True)
    var = jnp.mean((x - mu) ** 2, axis=-1, keepdims=True)
    return (x - mu) / jnp.sqrt(var + LN_EPS) * g + b


def ref_mha(x_q, x_kv, mask_bool, p):
    B, Sq, D = x_q.shape
    Sk = x_kv.shape[1]
    q = x_q @ p["wq"] + p["bq"]
    k = x_kv @ p["wk"] + p["bk"]
    v = x_kv @ p["wv"] + p["bv"]
    Q = q.reshape(B, Sq, N_HEADS, D_HEAD).transpose(0, 2, 1, 3)
    K = k.reshape(B, Sk, N_HEADS, D_HEAD).transpose(0, 2, 1, 3)
    V = v.reshape(B, Sk, N_HEADS, D_HEAD).transpose(0, 2, 1, 3)
    s = jnp.einsum("bhqd,bhkd->bhqk", Q, K) / math.sqrt(D_HEAD)
    s = jnp.where(mask_bool[:, None, :, :], -1e9, s)
    a = jax.nn.softmax(s, axis=-1)
    z = jnp.einsum("bhqk,bhkd->bhqd", a, V)
    z = z.transpose(0, 2, 1, 3).reshape(B, Sq, N_HEADS * D_HEAD)
    return z @ p["wo"] + p["bo"]


def ref_encoder_layer(x, mask_bool, p):
    x_norm = ref_layernorm(x, p["ln1_g"], p["ln1_b"])
    x1 = x + ref_mha(x_norm, x_norm, mask_bool, p)
    y = ref_layernorm(x1, p["ln2_g"], p["ln2_b"])
    h = jnp.maximum(y @ p["ffn_w1"] + p["ffn_b1"], 0.0)
    return x1 + (h @ p["ffn_w2"] + p["ffn_b2"])


# ============================ Param init ============================

def _init_linear(key, din, dout):
    k1, k2 = jax.random.split(key)
    bound = 1.0 / math.sqrt(din)
    w = jax.random.uniform(k1, (din, dout), jnp.float32, -bound, bound)
    b = jax.random.uniform(k2, (dout,), jnp.float32, -bound, bound)
    return w, b


def init_params(key):
    ks = jax.random.split(key, 10)
    wq, bq = _init_linear(ks[0], D_MODEL, D_MODEL)
    wk, bk = _init_linear(ks[1], D_MODEL, D_MODEL)
    wv, bv = _init_linear(ks[2], D_MODEL, D_MODEL)
    wo, bo = _init_linear(ks[3], D_MODEL, D_MODEL)
    w1, b1 = _init_linear(ks[4], D_MODEL, D_FFN)
    w2, b2 = _init_linear(ks[5], D_FFN, D_MODEL)
    return dict(
        wq=wq, bq=bq, wk=wk, bk=bk, wv=wv, bv=bv, wo=wo, bo=bo,
        ffn_w1=w1, ffn_b1=b1, ffn_w2=w2, ffn_b2=b2,
        ln1_g=1.0 + 0.1 * jax.random.normal(ks[6], (D_MODEL,), jnp.float32),
        ln1_b=0.1 * jax.random.normal(ks[7], (D_MODEL,), jnp.float32),
        ln2_g=1.0 + 0.1 * jax.random.normal(ks[8], (D_MODEL,), jnp.float32),
        ln2_b=0.1 * jax.random.normal(ks[9], (D_MODEL,), jnp.float32),
    )


# ============================ Main ============================

if __name__ == "__main__":
    key = jax.random.PRNGKey(0)
    kp, kx = jax.random.split(key)

    B, S = 2, 8
    params = init_params(kp)

    encoder_input = jax.random.normal(kx, (B, S, D_MODEL), jnp.float32)

    # Key-padding mask (True = masked): batch 1 has its last 3 positions padded.
    valid_lens = jnp.array([S, S - 3])
    pad = jnp.arange(S)[None, :] >= valid_lens[:, None]          # (B, S)
    encoder_mask = jnp.broadcast_to(pad[:, None, :], (B, S, S))  # (B, S, S)

    out = encoder_layer(encoder_input, encoder_mask, params)
    out = jax.block_until_ready(out)

    ref = ref_encoder_layer(encoder_input, encoder_mask, params)
    assert out.shape == (B, S, D_MODEL)
    max_err = float(jnp.max(jnp.abs(out - ref)))
    # bf16 MXU operands (f32 accumulate) -> slightly looser tolerance than f32.
    assert jnp.allclose(out, ref, atol=2e-2, rtol=2e-2), (
        f"mismatch vs reference: max abs err = {max_err}")

    print("KERNEL_OK")
</pallas_src>

<mosaic_0001>
module attributes {stable_mosaic.version = 11 : i64} {
  func.func @_encoder_layer_kernel(%arg0: i32, %arg1: memref<16x32xf32, #tpu.memory_space<vmem>>, %arg2: memref<2x8x8xf32, #tpu.memory_space<vmem>>, %arg3: memref<160x96xbf16, #tpu.memory_space<vmem>>, %arg4: memref<8x96xf32, #tpu.memory_space<vmem>>, %arg5: memref<16x32xf32, #tpu.memory_space<vmem>>) attributes {dimension_semantics = [#tpu.dimension_semantics<parallel>], iteration_bounds = array<i64: 1>, scalar_prefetch = 0 : i64, scratch_operands = 0 : i64, tpu.core_type = #tpu.core_type<tc>, window_params = [{transform_indices = @transform_0, window_bounds = array<i64: 16, 32>}, {transform_indices = @transform_1, window_bounds = array<i64: 2, 8, 8>}, {pipeline_mode = #tpu.pipeline_mode<synchronous>, transform_indices = @transform_2, window_bounds = array<i64: 160, 96>}, {pipeline_mode = #tpu.pipeline_mode<synchronous>, transform_indices = @transform_3, window_bounds = array<i64: 8, 96>}, {transform_indices = @transform_4, window_bounds = array<i64: 16, 32>}]} {
    %c0 = arith.constant 0 : index
    %c0_0 = arith.constant 0 : index
    %0 = vector.load %arg1[%c0, %c0_0] : memref<16x32xf32, #tpu.memory_space<vmem>>, vector<16x32xf32>
    %c0_1 = arith.constant 0 : index
    %c0_2 = arith.constant 0 : index
    %1 = vector.load %arg4[%c0_1, %c0_2] : memref<8x96xf32, #tpu.memory_space<vmem>>, vector<8x96xf32>
    %2 = vector.extract_strided_slice %1 {offsets = [0, 0], sizes = [1, 32], strides = [1, 1]} : vector<8x96xf32> to vector<1x32xf32>
    %3 = vector.extract_strided_slice %1 {offsets = [1, 0], sizes = [1, 32], strides = [1, 1]} : vector<8x96xf32> to vector<1x32xf32>
    %4 = vector.extract_strided_slice %1 {offsets = [2, 0], sizes = [1, 32], strides = [1, 1]} : vector<8x96xf32> to vector<1x32xf32>
    %5 = vector.extract_strided_slice %1 {offsets = [3, 0], sizes = [1, 32], strides = [1, 1]} : vector<8x96xf32> to vector<1x32xf32>
    %6 = vector.extract_strided_slice %1 {offsets = [4, 0], sizes = [1, 96], strides = [1, 1]} : vector<8x96xf32> to vector<1x96xf32>
    %7 = vector.extract_strided_slice %1 {offsets = [5, 0], sizes = [1, 32], strides = [1, 1]} : vector<8x96xf32> to vector<1x32xf32>
    %8 = vector.extract_strided_slice %1 {offsets = [6, 0], sizes = [1, 64], strides = [1, 1]} : vector<8x96xf32> to vector<1x64xf32>
    %9 = vector.extract_strided_slice %1 {offsets = [7, 0], sizes = [1, 32], strides = [1, 1]} : vector<8x96xf32> to vector<1x32xf32>
    %c0_3 = arith.constant 0 : index
    %c0_4 = arith.constant 0 : index
    %10 = vector.load %arg3[%c0_3, %c0_4] : memref<160x96xbf16, #tpu.memory_space<vmem>>, vector<32x96xbf16>
    %c32 = arith.constant 32 : index
    %c0_5 = arith.constant 0 : index
    %11 = vector.load %arg3[%c32, %c0_5] : memref<160x96xbf16, #tpu.memory_space<vmem>>, vector<32x32xbf16>
    %c64 = arith.constant 64 : index
    %c0_6 = arith.constant 0 : index
    %12 = vector.load %arg3[%c64, %c0_6] : memref<160x96xbf16, #tpu.memory_space<vmem>>, vector<32x64xbf16>
    %c96 = arith.constant 96 : index
    %c0_7 = arith.constant 0 : index
    %13 = vector.load %arg3[%c96, %c0_7] : memref<160x96xbf16, #tpu.memory_space<vmem>>, vector<64x32xbf16>
    %cst = arith.constant dense<0.000000e+00> : vector<16xf32>
    %14 = vector.multi_reduction <add>, %0, %cst [1] : vector<16x32xf32> to vector<16xf32>
    %15 = vector.shape_cast %14 : vector<16xf32> to vector<16x1xf32>
    %cst_8 = arith.constant 3.200000e+01 : f32
    %16 = vector.broadcast %cst_8 : f32 to vector<16x1xf32>
    %17 = arith.divf %15, %16 : vector<16x1xf32>
    %18 = vector.broadcast %17 : vector<16x1xf32> to vector<16x32xf32>
    %19 = arith.subf %0, %18 : vector<16x32xf32>
    %20 = arith.mulf %19, %19 : vector<16x32xf32>
    %cst_9 = arith.constant dense<0.000000e+00> : vector<16xf32>
    %21 = vector.multi_reduction <add>, %20, %cst_9 [1] : vector<16x32xf32> to vector<16xf32>
    %22 = vector.shape_cast %21 : vector<16xf32> to vector<16x1xf32>
    %cst_10 = arith.constant 3.200000e+01 : f32
    %23 = vector.broadcast %cst_10 : f32 to vector<16x1xf32>
    %24 = arith.divf %22, %23 : vector<16x1xf32>
    %25 = vector.broadcast %17 : vector<16x1xf32> to vector<16x32xf32>
    %26 = arith.subf %0, %25 : vector<16x32xf32>
    %cst_11 = arith.constant 9.99999974E-6 : f32
    %27 = vector.broadcast %cst_11 : f32 to vector<16x1xf32>
    %28 = arith.addf %24, %27 : vector<16x1xf32>
    %29 = math.rsqrt %28 : vector<16x1xf32>
    %30 = vector.broadcast %29 : vector<16x1xf32> to vector<16x32xf32>
    %31 = arith.mulf %26, %30 : vector<16x32xf32>
    %32 = vector.broadcast %2 : vector<1x32xf32> to vector<16x32xf32>
    %33 = arith.mulf %31, %32 : vector<16x32xf32>
    %34 = vector.broadcast %3 : vector<1x32xf32> to vector<16x32xf32>
    %35 = arith.addf %33, %34 : vector<16x32xf32>
    %36 = arith.truncf %35 : vector<16x32xf32> to vector<16x32xbf16>
    %cst_12 = arith.constant dense<0.000000e+00> : vector<16x96xf32>
    %37 = tpu.matmul %36, %10, %cst_12 {dimension_numbers = #tpu.dot_dimension_numbers<[1], [0], [0], [1], [0, 0, 1, 1], [], []>} : vector<16x32xbf16>, vector<32x96xbf16>, vector<16x96xf32> -> vector<16x96xf32>
    %38 = vector.broadcast %6 : vector<1x96xf32> to vector<16x96xf32>
    %39 = arith.addf %37, %38 : vector<16x96xf32>
    %c0_13 = arith.constant 0 : index
    %c0_14 = arith.constant 0 : index
    %c0_15 = arith.constant 0 : index
    %40 = vector.load %arg2[%c0_13, %c0_14, %c0_15] : memref<2x8x8xf32, #tpu.memory_space<vmem>>, vector<1x8x8xf32>
    %41 = vector.shape_cast %40 : vector<1x8x8xf32> to vector<8x8xf32>
    %42 = vector.extract_strided_slice %39 {offsets = [0, 0], sizes = [8, 32], strides = [1, 1]} : vector<16x96xf32> to vector<8x32xf32>
    %43 = vector.extract_strided_slice %39 {offsets = [0, 32], sizes = [8, 32], strides = [1, 1]} : vector<16x96xf32> to vector<8x32xf32>
    %44 = vector.extract_strided_slice %39 {offsets = [0, 64], sizes = [8, 32], strides = [1, 1]} : vector<16x96xf32> to vector<8x32xf32>
    %45 = vector.extract_strided_slice %42 {offsets = [0, 0], sizes = [8, 8], strides = [1, 1]} : vector<8x32xf32> to vector<8x8xf32>
    %46 = arith.truncf %45 : vector<8x8xf32> to vector<8x8xbf16>
    %47 = vector.extract_strided_slice %43 {offsets = [0, 0], sizes = [8, 8], strides = [1, 1]} : vector<8x32xf32> to vector<8x8xf32>
    %48 = arith.truncf %47 : vector<8x8xf32> to vector<8x8xbf16>
    %49 = vector.extract_strided_slice %44 {offsets = [0, 0], sizes = [8, 8], strides = [1, 1]} : vector<8x32xf32> to vector<8x8xf32>
    %50 = arith.truncf %49 : vector<8x8xf32> to vector<8x8xbf16>
    %cst_16 = arith.constant dense<0.000000e+00> : vector<8x8xf32>
    %51 = tpu.matmul %46, %48, %cst_16 {dimension_numbers = #tpu.dot_dimension_numbers<[1], [1], [0], [0], [0, 0, 1, 0], [], []>} : vector<8x8xbf16>, vector<8x8xbf16>, vector<8x8xf32> -> vector<8x8xf32>
    %52 = arith.addf %51, %41 : vector<8x8xf32>
    %cst_17 = arith.constant dense<0xFF800000> : vector<8xf32>
    %53 = vector.multi_reduction <maximumf>, %52, %cst_17 [1] : vector<8x8xf32> to vector<8xf32>
    %54 = vector.shape_cast %53 : vector<8xf32> to vector<8x1xf32>
    %55 = vector.broadcast %54 : vector<8x1xf32> to vector<8x8xf32>
    %56 = arith.subf %52, %55 : vector<8x8xf32>
    %57 = math.exp %56 : vector<8x8xf32>
    %cst_18 = arith.constant dense<0.000000e+00> : vector<8xf32>
    %58 = vector.multi_reduction <add>, %57, %cst_18 [1] : vector<8x8xf32> to vector<8xf32>
    %59 = vector.shape_cast %58 : vector<8xf32> to vector<8x1xf32>
    %60 = tpu.reciprocal %59 {approx = true} : vector<8x1xf32> -> vector<8x1xf32>
    %61 = vector.broadcast %60 : vector<8x1xf32> to vector<8x8xf32>
    %62 = arith.mulf %57, %61 : vector<8x8xf32>
    %63 = arith.truncf %62 : vector<8x8xf32> to vector<8x8xbf16>
    %cst_19 = arith.constant dense<0.000000e+00> : vector<8x8xf32>
    %64 = tpu.matmul %63, %50, %cst_19 {dimension_numbers = #tpu.dot_dimension_numbers<[1], [0], [0], [1], [0, 0, 1, 1], [], []>} : vector<8x8xbf16>, vector<8x8xbf16>, vector<8x8xf32> -> vector<8x8xf32>
    %65 = vector.extract_strided_slice %42 {offsets = [0, 8], sizes = [8, 8], strides = [1, 1]} : vector<8x32xf32> to vector<8x8xf32>
    %66 = arith.truncf %65 : vector<8x8xf32> to vector<8x8xbf16>
    %67 = vector.extract_strided_slice %43 {offsets = [0, 8], sizes = [8, 8], strides = [1, 1]} : vector<8x32xf32> to vector<8x8xf32>
    %68 = arith.truncf %67 : vector<8x8xf32> to vector<8x8xbf16>
    %69 = vector.extract_strided_slice %44 {offsets = [0, 8], sizes = [8, 8], strides = [1, 1]} : vector<8x32xf32> to vector<8x8xf32>
    %70 = arith.truncf %69 : vector<8x8xf32> to vector<8x8xbf16>
    %cst_20 = arith.constant dense<0.000000e+00> : vector<8x8xf32>
    %71 = tpu.matmul %66, %68, %cst_20 {dimension_numbers = #tpu.dot_dimension_numbers<[1], [1], [0], [0], [0, 0, 1, 0], [], []>} : vector<8x8xbf16>, vector<8x8xbf16>, vector<8x8xf32> -> vector<8x8xf32>
    %72 = arith.addf %71, %41 : vector<8x8xf32>
    %cst_21 = arith.constant dense<0xFF800000> : vector<8xf32>
    %73 = vector.multi_reduction <maximumf>, %72, %cst_21 [1] : vector<8x8xf32> to vector<8xf32>
    %74 = vector.shape_cast %73 : vector<8xf32> to vector<8x1xf32>
    %75 = vector.broadcast %74 : vector<8x1xf32> to vector<8x8xf32>
    %76 = arith.subf %72, %75 : vector<8x8xf32>
    %77 = math.exp %76 : vector<8x8xf32>
    %cst_22 = arith.constant dense<0.000000e+00> : vector<8xf32>
    %78 = vector.multi_reduction <add>, %77, %cst_22 [1] : vector<8x8xf32> to vector<8xf32>
    %79 = vector.shape_cast %78 : vector<8xf32> to vector<8x1xf32>
    %80 = tpu.reciprocal %79 {approx = true} : vector<8x1xf32> -> vector<8x1xf32>
    %81 = vector.broadcast %80 : vector<8x1xf32> to vector<8x8xf32>
    %82 = arith.mulf %77, %81 : vector<8x8xf32>
    %83 = arith.truncf %82 : vector<8x8xf32> to vector<8x8xbf16>
    %cst_23 = arith.constant dense<0.000000e+00> : vector<8x8xf32>
    %84 = tpu.matmul %83, %70, %cst_23 {dimension_numbers = #tpu.dot_dimension_numbers<[1], [0], [0], [1], [0, 0, 1, 1], [], []>} : vector<8x8xbf16>, vector<8x8xbf16>, vector<8x8xf32> -> vector<8x8xf32>
    %85 = vector.extract_strided_slice %42 {offsets = [0, 16], sizes = [8, 8], strides = [1, 1]} : vector<8x32xf32> to vector<8x8xf32>
    %86 = arith.truncf %85 : vector<8x8xf32> to vector<8x8xbf16>
    %87 = vector.extract_strided_slice %43 {offsets = [0, 16], sizes = [8, 8], strides = [1, 1]} : vector<8x32xf32> to vector<8x8xf32>
    %88 = arith.truncf %87 : vector<8x8xf32> to vector<8x8xbf16>
    %89 = vector.extract_strided_slice %44 {offsets = [0, 16], sizes = [8, 8], strides = [1, 1]} : vector<8x32xf32> to vector<8x8xf32>
    %90 = arith.truncf %89 : vector<8x8xf32> to vector<8x8xbf16>
    %cst_24 = arith.constant dense<0.000000e+00> : vector<8x8xf32>
    %91 = tpu.matmul %86, %88, %cst_24 {dimension_numbers = #tpu.dot_dimension_numbers<[1], [1], [0], [0], [0, 0, 1, 0], [], []>} : vector<8x8xbf16>, vector<8x8xbf16>, vector<8x8xf32> -> vector<8x8xf32>
    %92 = arith.addf %91, %41 : vector<8x8xf32>
    %cst_25 = arith.constant dense<0xFF800000> : vector<8xf32>
    %93 = vector.multi_reduction <maximumf>, %92, %cst_25 [1] : vector<8x8xf32> to vector<8xf32>
    %94 = vector.shape_cast %93 : vector<8xf32> to vector<8x1xf32>
    %95 = vector.broadcast %94 : vector<8x1xf32> to vector<8x8xf32>
    %96 = arith.subf %92, %95 : vector<8x8xf32>
    %97 = math.exp %96 : vector<8x8xf32>
    %cst_26 = arith.constant dense<0.000000e+00> : vector<8xf32>
    %98 = vector.multi_reduction <add>, %97, %cst_26 [1] : vector<8x8xf32> to vector<8xf32>
    %99 = vector.shape_cast %98 : vector<8xf32> to vector<8x1xf32>
    %100 = tpu.reciprocal %99 {approx = true} : vector<8x1xf32> -> vector<8x1xf32>
    %101 = vector.broadcast %100 : vector<8x1xf32> to vector<8x8xf32>
    %102 = arith.mulf %97, %101 : vector<8x8xf32>
    %103 = arith.truncf %102 : vector<8x8xf32> to vector<8x8xbf16>
    %cst_27 = arith.constant dense<0.000000e+00> : vector<8x8xf32>
    %104 = tpu.matmul %103, %90, %cst_27 {dimension_numbers = #tpu.dot_dimension_numbers<[1], [0], [0], [1], [0, 0, 1, 1], [], []>} : vector<8x8xbf16>, vector<8x8xbf16>, vector<8x8xf32> -> vector<8x8xf32>
    %105 = vector.extract_strided_slice %42 {offsets = [0, 24], sizes = [8, 8], strides = [1, 1]} : vector<8x32xf32> to vector<8x8xf32>
    %106 = arith.truncf %105 : vector<8x8xf32> to vector<8x8xbf16>
    %107 = vector.extract_strided_slice %43 {offsets = [0, 24], sizes = [8, 8], strides = [1, 1]} : vector<8x32xf32> to vector<8x8xf32>
    %108 = arith.truncf %107 : vector<8x8xf32> to vector<8x8xbf16>
    %109 = vector.extract_strided_slice %44 {offsets = [0, 24], sizes = [8, 8], strides = [1, 1]} : vector<8x32xf32> to vector<8x8xf32>
    %110 = arith.truncf %109 : vector<8x8xf32> to vector<8x8xbf16>
    %cst_28 = arith.constant dense<0.000000e+00> : vector<8x8xf32>
    %111 = tpu.matmul %106, %108, %cst_28 {dimension_numbers = #tpu.dot_dimension_numbers<[1], [1], [0], [0], [0, 0, 1, 0], [], []>} : vector<8x8xbf16>, vector<8x8xbf16>, vector<8x8xf32> -> vector<8x8xf32>
    %112 = arith.addf %111, %41 : vector<8x8xf32>
    %cst_29 = arith.constant dense<0xFF800000> : vector<8xf32>
    %113 = vector.multi_reduction <maximumf>, %112, %cst_29 [1] : vector<8x8xf32> to vector<8xf32>
    %114 = vector.shape_cast %113 : vector<8xf32> to vector<8x1xf32>
    %115 = vector.broadcast %114 : vector<8x1xf32> to vector<8x8xf32>
    %116 = arith.subf %112, %115 : vector<8x8xf32>
    %117 = math.exp %116 : vector<8x8xf32>
    %cst_30 = arith.constant dense<0.000000e+00> : vector<8xf32>
    %118 = vector.multi_reduction <add>, %117, %cst_30 [1] : vector<8x8xf32> to vector<8xf32>
    %119 = vector.shape_cast %118 : vector<8xf32> to vector<8x1xf32>
    %120 = tpu.reciprocal %119 {approx = true} : vector<8x1xf32> -> vector<8x1xf32>
    %121 = vector.broadcast %120 : vector<8x1xf32> to vector<8x8xf32>
    %122 = arith.mulf %117, %121 : vector<8x8xf32>
    %123 = arith.truncf %122 : vector<8x8xf32> to vector<8x8xbf16>
    %cst_31 = arith.constant dense<0.000000e+00> : vector<8x8xf32>
    %124 = tpu.matmul %123, %110, %cst_31 {dimension_numbers = #tpu.dot_dimension_numbers<[1], [0], [0], [1], [0, 0, 1, 1], [], []>} : vector<8x8xbf16>, vector<8x8xbf16>, vector<8x8xf32> -> vector<8x8xf32>
    %125 = tpu.concatenate %64, %84, %104, %124 in 1 : vector<8x8xf32>, vector<8x8xf32>, vector<8x8xf32>, vector<8x8xf32> -> vector<8x32xf32>
    %c1 = arith.constant 1 : index
    %c0_32 = arith.constant 0 : index
    %c0_33 = arith.constant 0 : index
    %126 = vector.load %arg2[%c1, %c0_32, %c0_33] : memref<2x8x8xf32, #tpu.memory_space<vmem>>, vector<1x8x8xf32>
    %127 = vector.shape_cast %126 : vector<1x8x8xf32> to vector<8x8xf32>
    %128 = vector.extract_strided_slice %39 {offsets = [8, 0], sizes = [8, 32], strides = [1, 1]} : vector<16x96xf32> to vector<8x32xf32>
    %129 = vector.extract_strided_slice %39 {offsets = [8, 32], sizes = [8, 32], strides = [1, 1]} : vector<16x96xf32> to vector<8x32xf32>
    %130 = vector.extract_strided_slice %39 {offsets = [8, 64], sizes = [8, 32], strides = [1, 1]} : vector<16x96xf32> to vector<8x32xf32>
    %131 = vector.extract_strided_slice %128 {offsets = [0, 0], sizes = [8, 8], strides = [1, 1]} : vector<8x32xf32> to vector<8x8xf32>
    %132 = arith.truncf %131 : vector<8x8xf32> to vector<8x8xbf16>
    %133 = vector.extract_strided_slice %129 {offsets = [0, 0], sizes = [8, 8], strides = [1, 1]} : vector<8x32xf32> to vector<8x8xf32>
    %134 = arith.truncf %133 : vector<8x8xf32> to vector<8x8xbf16>
    %135 = vector.extract_strided_slice %130 {offsets = [0, 0], sizes = [8, 8], strides = [1, 1]} : vector<8x32xf32> to vector<8x8xf32>
    %136 = arith.truncf %135 : vector<8x8xf32> to vector<8x8xbf16>
    %cst_34 = arith.constant dense<0.000000e+00> : vector<8x8xf32>
    %137 = tpu.matmul %132, %134, %cst_34 {dimension_numbers = #tpu.dot_dimension_numbers<[1], [1], [0], [0], [0, 0, 1, 0], [], []>} : vector<8x8xbf16>, vector<8x8xbf16>, vector<8x8xf32> -> vector<8x8xf32>
    %138 = arith.addf %137, %127 : vector<8x8xf32>
    %cst_35 = arith.constant dense<0xFF800000> : vector<8xf32>
    %139 = vector.multi_reduction <maximumf>, %138, %cst_35 [1] : vector<8x8xf32> to vector<8xf32>
    %140 = vector.shape_cast %139 : vector<8xf32> to vector<8x1xf32>
    %141 = vector.broadcast %140 : vector<8x1xf32> to vector<8x8xf32>
    %142 = arith.subf %138, %141 : vector<8x8xf32>
    %143 = math.exp %142 : vector<8x8xf32>
    %cst_36 = arith.constant dense<0.000000e+00> : vector<8xf32>
    %144 = vector.multi_reduction <add>, %143, %cst_36 [1] : vector<8x8xf32> to vector<8xf32>
    %145 = vector.shape_cast %144 : vector<8xf32> to vector<8x1xf32>
    %146 = tpu.reciprocal %145 {approx = true} : vector<8x1xf32> -> vector<8x1xf32>
    %147 = vector.broadcast %146 : vector<8x1xf32> to vector<8x8xf32>
    %148 = arith.mulf %143, %147 : vector<8x8xf32>
    %149 = arith.truncf %148 : vector<8x8xf32> to vector<8x8xbf16>
    %cst_37 = arith.constant dense<0.000000e+00> : vector<8x8xf32>
    %150 = tpu.matmul %149, %136, %cst_37 {dimension_numbers = #tpu.dot_dimension_numbers<[1], [0], [0], [1], [0, 0, 1, 1], [], []>} : vector<8x8xbf16>, vector<8x8xbf16>, vector<8x8xf32> -> vector<8x8xf32>
    %151 = vector.extract_strided_slice %128 {offsets = [0, 8], sizes = [8, 8], strides = [1, 1]} : vector<8x32xf32> to vector<8x8xf32>
    %152 = arith.truncf %151 : vector<8x8xf32> to vector<8x8xbf16>
    %153 = vector.extract_strided_slice %129 {offsets = [0, 8], sizes = [8, 8], strides = [1, 1]} : vector<8x32xf32> to vector<8x8xf32>
    %154 = arith.truncf %153 : vector<8x8xf32> to vector<8x8xbf16>
    %155 = vector.extract_strided_slice %130 {offsets = [0, 8], sizes = [8, 8], strides = [1, 1]} : vector<8x32xf32> to vector<8x8xf32>
    %156 = arith.truncf %155 : vector<8x8xf32> to vector<8x8xbf16>
    %cst_38 = arith.constant dense<0.000000e+00> : vector<8x8xf32>
    %157 = tpu.matmul %152, %154, %cst_38 {dimension_numbers = #tpu.dot_dimension_numbers<[1], [1], [0], [0], [0, 0, 1, 0], [], []>} : vector<8x8xbf16>, vector<8x8xbf16>, vector<8x8xf32> -> vector<8x8xf32>
    %158 = arith.addf %157, %127 : vector<8x8xf32>
    %cst_39 = arith.constant dense<0xFF800000> : vector<8xf32>
    %159 = vector.multi_reduction <maximumf>, %158, %cst_39 [1] : vector<8x8xf32> to vector<8xf32>
    %160 = vector.shape_cast %159 : vector<8xf32> to vector<8x1xf32>
    %161 = vector.broadcast %160 : vector<8x1xf32> to vector<8x8xf32>
    %162 = arith.subf %158, %161 : vector<8x8xf32>
    %163 = math.exp %162 : vector<8x8xf32>
    %cst_40 = arith.constant dense<0.000000e+00> : vector<8xf32>
    %164 = vector.multi_reduction <add>, %163, %cst_40 [1] : vector<8x8xf32> to vector<8xf32>
    %165 = vector.shape_cast %164 : vector<8xf32> to vector<8x1xf32>
    %166 = tpu.reciprocal %165 {approx = true} : vector<8x1xf32> -> vector<8x1xf32>
    %167 = vector.broadcast %166 : vector<8x1xf32> to vector<8x8xf32>
    %168 = arith.mulf %163, %167 : vector<8x8xf32>
    %169 = arith.truncf %168 : vector<8x8xf32> to vector<8x8xbf16>
    %cst_41 = arith.constant dense<0.000000e+00> : vector<8x8xf32>
    %170 = tpu.matmul %169, %156, %cst_41 {dimension_numbers = #tpu.dot_dimension_numbers<[1], [0], [0], [1], [0, 0, 1, 1], [], []>} : vector<8x8xbf16>, vector<8x8xbf16>, vector<8x8xf32> -> vector<8x8xf32>
    %171 = vector.extract_strided_slice %128 {offsets = [0, 16], sizes = [8, 8], strides = [1, 1]} : vector<8x32xf32> to vector<8x8xf32>
    %172 = arith.truncf %171 : vector<8x8xf32> to vector<8x8xbf16>
    %173 = vector.extract_strided_slice %129 {offsets = [0, 16], sizes = [8, 8], strides = [1, 1]} : vector<8x32xf32> to vector<8x8xf32>
    %174 = arith.truncf %173 : vector<8x8xf32> to vector<8x8xbf16>
    %175 = vector.extract_strided_slice %130 {offsets = [0, 16], sizes = [8, 8], strides = [1, 1]} : vector<8x32xf32> to vector<8x8xf32>
    %176 = arith.truncf %175 : vector<8x8xf32> to vector<8x8xbf16>
    %cst_42 = arith.constant dense<0.000000e+00> : vector<8x8xf32>
    %177 = tpu.matmul %172, %174, %cst_42 {dimension_numbers = #tpu.dot_dimension_numbers<[1], [1], [0], [0], [0, 0, 1, 0], [], []>} : vector<8x8xbf16>, vector<8x8xbf16>, vector<8x8xf32> -> vector<8x8xf32>
    %178 = arith.addf %177, %127 : vector<8x8xf32>
    %cst_43 = arith.constant dense<0xFF800000> : vector<8xf32>
    %179 = vector.multi_reduction <maximumf>, %178, %cst_43 [1] : vector<8x8xf32> to vector<8xf32>
    %180 = vector.shape_cast %179 : vector<8xf32> to vector<8x1xf32>
    %181 = vector.broadcast %180 : vector<8x1xf32> to vector<8x8xf32>
    %182 = arith.subf %178, %181 : vector<8x8xf32>
    %183 = math.exp %182 : vector<8x8xf32>
    %cst_44 = arith.constant dense<0.000000e+00> : vector<8xf32>
    %184 = vector.multi_reduction <add>, %183, %cst_44 [1] : vector<8x8xf32> to vector<8xf32>
    %185 = vector.shape_cast %184 : vector<8xf32> to vector<8x1xf32>
    %186 = tpu.reciprocal %185 {approx = true} : vector<8x1xf32> -> vector<8x1xf32>
    %187 = vector.broadcast %186 : vector<8x1xf32> to vector<8x8xf32>
    %188 = arith.mulf %183, %187 : vector<8x8xf32>
    %189 = arith.truncf %188 : vector<8x8xf32> to vector<8x8xbf16>
    %cst_45 = arith.constant dense<0.000000e+00> : vector<8x8xf32>
    %190 = tpu.matmul %189, %176, %cst_45 {dimension_numbers = #tpu.dot_dimension_numbers<[1], [0], [0], [1], [0, 0, 1, 1], [], []>} : vector<8x8xbf16>, vector<8x8xbf16>, vector<8x8xf32> -> vector<8x8xf32>
    %191 = vector.extract_strided_slice %128 {offsets = [0, 24], sizes = [8, 8], strides = [1, 1]} : vector<8x32xf32> to vector<8x8xf32>
    %192 = arith.truncf %191 : vector<8x8xf32> to vector<8x8xbf16>
    %193 = vector.extract_strided_slice %129 {offsets = [0, 24], sizes = [8, 8], strides = [1, 1]} : vector<8x32xf32> to vector<8x8xf32>
    %194 = arith.truncf %193 : vector<8x8xf32> to vector<8x8xbf16>
    %195 = vector.extract_strided_slice %130 {offsets = [0, 24], sizes = [8, 8], strides = [1, 1]} : vector<8x32xf32> to vector<8x8xf32>
    %196 = arith.truncf %195 : vector<8x8xf32> to vector<8x8xbf16>
    %cst_46 = arith.constant dense<0.000000e+00> : vector<8x8xf32>
    %197 = tpu.matmul %192, %194, %cst_46 {dimension_numbers = #tpu.dot_dimension_numbers<[1], [1], [0], [0], [0, 0, 1, 0], [], []>} : vector<8x8xbf16>, vector<8x8xbf16>, vector<8x8xf32> -> vector<8x8xf32>
    %198 = arith.addf %197, %127 : vector<8x8xf32>
    %cst_47 = arith.constant dense<0xFF800000> : vector<8xf32>
    %199 = vector.multi_reduction <maximumf>, %198, %cst_47 [1] : vector<8x8xf32> to vector<8xf32>
    %200 = vector.shape_cast %199 : vector<8xf32> to vector<8x1xf32>
    %201 = vector.broadcast %200 : vector<8x1xf32> to vector<8x8xf32>
    %202 = arith.subf %198, %201 : vector<8x8xf32>
    %203 = math.exp %202 : vector<8x8xf32>
    %cst_48 = arith.constant dense<0.000000e+00> : vector<8xf32>
    %204 = vector.multi_reduction <add>, %203, %cst_48 [1] : vector<8x8xf32> to vector<8xf32>
    %205 = vector.shape_cast %204 : vector<8xf32> to vector<8x1xf32>
    %206 = tpu.reciprocal %205 {approx = true} : vector<8x1xf32> -> vector<8x1xf32>
    %207 = vector.broadcast %206 : vector<8x1xf32> to vector<8x8xf32>
    %208 = arith.mulf %203, %207 : vector<8x8xf32>
    %209 = arith.truncf %208 : vector<8x8xf32> to vector<8x8xbf16>
    %cst_49 = arith.constant dense<0.000000e+00> : vector<8x8xf32>
    %210 = tpu.matmul %209, %196, %cst_49 {dimension_numbers = #tpu.dot_dimension_numbers<[1], [0], [0], [1], [0, 0, 1, 1], [], []>} : vector<8x8xbf16>, vector<8x8xbf16>, vector<8x8xf32> -> vector<8x8xf32>
    %211 = tpu.concatenate %150, %170, %190, %210 in 1 : vector<8x8xf32>, vector<8x8xf32>, vector<8x8xf32>, vector<8x8xf32> -> vector<8x32xf32>
    %212 = tpu.concatenate %125, %211 in 0 : vector<8x32xf32>, vector<8x32xf32> -> vector<16x32xf32>
    %213 = arith.truncf %212 : vector<16x32xf32> to vector<16x32xbf16>
    %cst_50 = arith.constant dense<0.000000e+00> : vector<16x32xf32>
    %214 = tpu.matmul %213, %11, %cst_50 {dimension_numbers = #tpu.dot_dimension_numbers<[1], [0], [0], [1], [0, 0, 1, 1], [], []>} : vector<16x32xbf16>, vector<32x32xbf16>, vector<16x32xf32> -> vector<16x32xf32>
    %215 = vector.broadcast %7 : vector<1x32xf32> to vector<16x32xf32>
    %216 = arith.addf %214, %215 : vector<16x32xf32>
    %217 = arith.addf %0, %216 : vector<16x32xf32>
    %cst_51 = arith.constant dense<0.000000e+00> : vector<16xf32>
    %218 = vector.multi_reduction <add>, %217, %cst_51 [1] : vector<16x32xf32> to vector<16xf32>
    %219 = vector.shape_cast %218 : vector<16xf32> to vector<16x1xf32>
    %cst_52 = arith.constant 3.200000e+01 : f32
    %220 = vector.broadcast %cst_52 : f32 to vector<16x1xf32>
    %221 = arith.divf %219, %220 : vector<16x1xf32>
    %222 = vector.broadcast %221 : vector<16x1xf32> to vector<16x32xf32>
    %223 = arith.subf %217, %222 : vector<16x32xf32>
    %224 = arith.mulf %223, %223 : vector<16x32xf32>
    %cst_53 = arith.constant dense<0.000000e+00> : vector<16xf32>
    %225 = vector.multi_reduction <add>, %224, %cst_53 [1] : vector<16x32xf32> to vector<16xf32>
    %226 = vector.shape_cast %225 : vector<16xf32> to vector<16x1xf32>
    %cst_54 = arith.constant 3.200000e+01 : f32
    %227 = vector.broadcast %cst_54 : f32 to vector<16x1xf32>
    %228 = arith.divf %226, %227 : vector<16x1xf32>
    %229 = vector.broadcast %221 : vector<16x1xf32> to vector<16x32xf32>
    %230 = arith.subf %217, %229 : vector<16x32xf32>
    %cst_55 = arith.constant 9.99999974E-6 : f32
    %231 = vector.broadcast %cst_55 : f32 to vector<16x1xf32>
    %232 = arith.addf %228, %231 : vector<16x1xf32>
    %233 = math.rsqrt %232 : vector<16x1xf32>
    %234 = vector.broadcast %233 : vector<16x1xf32> to vector<16x32xf32>
    %235 = arith.mulf %230, %234 : vector<16x32xf32>
    %236 = vector.broadcast %4 : vector<1x32xf32> to vector<16x32xf32>
    %237 = arith.mulf %235, %236 : vector<16x32xf32>
    %238 = vector.broadcast %5 : vector<1x32xf32> to vector<16x32xf32>
    %239 = arith.addf %237, %238 : vector<16x32xf32>
    %240 = arith.truncf %239 : vector<16x32xf32> to vector<16x32xbf16>
    %cst_56 = arith.constant dense<0.000000e+00> : vector<16x64xf32>
    %241 = tpu.matmul %240, %12, %cst_56 {dimension_numbers = #tpu.dot_dimension_numbers<[1], [0], [0], [1], [0, 0, 1, 1], [], []>} : vector<16x32xbf16>, vector<32x64xbf16>, vector<16x64xf32> -> vector<16x64xf32>
    %242 = vector.broadcast %8 : vector<1x64xf32> to vector<16x64xf32>
    %243 = arith.addf %241, %242 : vector<16x64xf32>
    %cst_57 = arith.constant 0.000000e+00 : f32
    %244 = vector.broadcast %cst_57 : f32 to vector<16x64xf32>
    %245 = arith.maximumf %243, %244 : vector<16x64xf32>
    %246 = arith.truncf %245 : vector<16x64xf32> to vector<16x64xbf16>
    %cst_58 = arith.constant dense<0.000000e+00> : vector<16x32xf32>
    %247 = tpu.matmul %246, %13, %cst_58 {dimension_numbers = #tpu.dot_dimension_numbers<[1], [0], [0], [1], [0, 0, 1, 1], [], []>} : vector<16x64xbf16>, vector<64x32xbf16>, vector<16x32xf32> -> vector<16x32xf32>
    %248 = vector.broadcast %9 : vector<1x32xf32> to vector<16x32xf32>
    %249 = arith.addf %247, %248 : vector<16x32xf32>
    %250 = arith.addf %217, %249 : vector<16x32xf32>
    %c0_59 = arith.constant 0 : index
    %c0_60 = arith.constant 0 : index
    %251 = vector.load %arg5[%c0_59, %c0_60] : memref<16x32xf32, #tpu.memory_space<vmem>>, vector<16x32xf32>
    tpu.vector_store %arg5[%c0_59, %c0_60], %250 {strides = array<i32>} : memref<16x32xf32, #tpu.memory_space<vmem>>, vector<16x32xf32>,
    return
  }
  func.func @transform_0(%arg0: i32) -> (i32, i32) {
    %c0_i32 = arith.constant 0 : i32
    %c0_i32_0 = arith.constant 0 : i32
    return %arg0, %c0_i32 : i32, i32
  }
  func.func @transform_1(%arg0: i32) -> (i32, i32, i32) {
    %c0_i32 = arith.constant 0 : i32
    %c0_i32_0 = arith.constant 0 : i32
    %c0_i32_1 = arith.constant 0 : i32
    return %arg0, %c0_i32, %c0_i32_0 : i32, i32, i32
  }
  func.func @transform_2(%arg0: i32) -> (i32, i32) {
    %c0_i32 = arith.constant 0 : i32
    %c0_i32_0 = arith.constant 0 : i32
    %c0_i32_1 = arith.constant 0 : i32
    return %c0_i32, %c0_i32_0 : i32, i32
  }
  func.func @transform_3(%arg0: i32) -> (i32, i32) {
    %c0_i32 = arith.constant 0 : i32
    %c0_i32_0 = arith.constant 0 : i32
    %c0_i32_1 = arith.constant 0 : i32
    return %c0_i32, %c0_i32_0 : i32, i32
  }
  func.func @transform_4(%arg0: i32) -> (i32, i32) {
    %c0_i32 = arith.constant 0 : i32
    %c0_i32_0 = arith.constant 0 : i32
    return %arg0, %c0_i32 : i32, i32
  }
}

</mosaic_0001>

<bundles_post_ra>
// kernel: tpu_custom_call.1
= control target key start
LH: loop header
LB: loop body
LE: loop exit
PB: predicated region body
PF: predicated region fallthrough
CT: control target
= control target key end

     0   :  { %9 = vsyncpa [#allocation3], 0  ;;  %s2096_s0 = inlined_call_operand.hbm [shape: f32[16,32], index: 0, kind: input, shape index: {}]   ;;  %s2097_s1 = inlined_call_operand.hbm [shape: f32[2,8,8], index: 1, kind: input, shape index: {}]   ;;  %s2098_s2 = inlined_call_operand.hbm [shape: bf16[160,96], index: 2, kind: input, shape index: {}]   ;;  %s2099_s3 = inlined_call_operand.hbm [shape: f32[8,96], index: 3, kind: input, shape index: {}]   ;;  %s2100_s4 = inlined_call_operand.hbm [shape: f32[16,32], index: 4, kind: output, shape index: {}]  }
   0x1   :  { %10 = vsyncpa [#allocation6], 0 }
   0x2   :  { %11 = vsyncpa [#allocation9], 0 }
   0x3   :  { %12 = vsyncpa [#allocation4], 0  ;;  %s1778_s15 = smov [#allocation5]   ;;  %s1779_s17 = smov [#allocation2]  }
   0x4   :  { %s30_s16 = sshll.u32 %s1778_s15, 4  ;;  %s18_s18 = sshll.u32 %s1779_s17, 4  ;;  %s31_s16 = int_to_ptr.vmem [resolvable:$true] %s30_s16  ;;  %s19_s18 = int_to_ptr.vmem [resolvable:$true] %s18_s18 }
   0x5   :  { %s1678_s19 = scalar_lea.vmem %s31_s16, 256  ;;  %p1683_p1 = scmp.lt.s32.totalorder %s31_s16, %s31_s16 }
   0x6   :  { %p1679_p0 = scmp.ne.s32.totalorder %s31_s16, %s1678_s19  ;;  %p1684_p2 = scmp.lt.s32.totalorder %s1678_s19, %s1678_s19 }
   0x8   :  { %p1685_p3 = por %p1684_p2, %p1683_p1 }
   0xa   :  { %p1686_p4 = pnand %p1685_p3, %p1679_p0 }
   0xc   :  { %1689 = shalt.err (!%p1686_p4)
}
   0xd   :  { %s1780_s20 = smov 128   ;;  %s1781_s21 = smov 8  }
   0xe   :  { %36 = dma.hbm_to_vmem [thread:$0]  %s2097_s1, 256, %s31_s16, [#allocation6], %s1780_s20, %s1780_s20, %s1781_s21  }
   0xf   :  { %s1698_s24 = scalar_lea.vmem %s19_s18, 256  ;;  %p1703_p6 = scmp.lt.s32.totalorder %s19_s18, %s19_s18 }
  0x10   :  { %p1699_p5 = scmp.ne.s32.totalorder %s19_s18, %s1698_s24  ;;  %p1704_p7 = scmp.lt.s32.totalorder %s1698_s24, %s1698_s24 }
  0x12   :  { %p1705_p8 = por %p1704_p7, %p1703_p6 }
  0x14   :  { %p1706_p9 = pnand %p1705_p8, %p1699_p5 }
  0x16   :  { %1709 = shalt.err (!%p1706_p9)
}
  0x17   :  { %24 = dma.hbm_to_vmem [thread:$0]  %s2096_s0, 256, %s19_s18, [#allocation3], %s1780_s20, %s1780_s20, %s1781_s21  }
  0x18   :  { %s1782_s27 = smov [#allocation7]  }
  0x19   :  { %s42_s28 = sshll.u32 %s1782_s27, 4  ;;  %s43_s28 = int_to_ptr.vmem [resolvable:$true] %s42_s28 }
  0x1a   :  { %s1718_s29 = scalar_lea.vmem %s43_s28, 1280  ;;  %p1723_p11 = scmp.lt.s32.totalorder %s43_s28, %s43_s28 }
  0x1b   :  { %p1719_p10 = scmp.ne.s32.totalorder %s43_s28, %s1718_s29  ;;  %p1724_p12 = scmp.lt.s32.totalorder %s1718_s29, %s1718_s29 }
  0x1d   :  { %p1725_p13 = por %p1724_p12, %p1723_p11 }
  0x1f   :  { %p1726_p0 = pnand %p1725_p13, %p1719_p10 }
  0x21   :  { %1729 = shalt.err (!%p1726_p0)
}
  0x22   :  { %s1783_s1 = smov 64   ;;  %s1784_s30 = smov 4  }
  0x23   :  { %48 = dma.hbm_to_vmem [thread:$0]  %s2098_s2, 1280, %s43_s28, [#allocation6], %s1783_s1, %s1783_s1, %s1784_s30  }
  0x24   :  { %s1785_s7 = smov [#allocation8]  }
  0x25   :  { %s55_s0 = sshll.u32 %s1785_s7, 4  ;;  %s56_s0 = int_to_ptr.vmem [resolvable:$true] %s55_s0 }
  0x26   :  { %s1738_s8 = scalar_lea.vmem %s56_s0, 128  ;;  %p1743_p2 = scmp.lt.s32.totalorder %s56_s0, %s56_s0 }
  0x27   :  { %p1739_p1 = scmp.ne.s32.totalorder %s56_s0, %s1738_s8  ;;  %p1744_p3 = scmp.lt.s32.totalorder %s1738_s8, %s1738_s8 }
  0x29   :  { %p1745_p4 = por %p1744_p3, %p1743_p2 }
  0x2b   :  { %p1746_p5 = pnand %p1745_p4, %p1739_p1 }
  0x2d   :  { %1749 = shalt.err (!%p1746_p5)
}
  0x2e   :  { %58 = dma.hbm_to_vmem [thread:$0]  %s2099_s3, 128, %s56_s0, [#allocation9]  }
  0x2f   :  { %1770 = dma.done.wait [#allocation3], 256  }
  0x30   :  { %1771 = vsyncadd [#allocation3], 4294967040 }
  0x31   :  { %1772 = dma.done.wait [#allocation6], 1536  }
  0x32   :  { %1773 = vsyncadd [#allocation6], 4294965760 }
  0x33   :  { %1774 = dma.done.wait [#allocation9], 128  }
  0x34   :  { %1775 = vsyncadd [#allocation9], 4294967168  ;;  %vm95_vm0 = vcmask 261120   ;;  %v1846_v0 = vld [vmem:[#allocation2] sm:$0xff]  ;;  %v1848_v1 = vld [vmem:[#allocation2 + $0x8] sm:$0xff]  ;;  %v1786_v15 = vmov 0.0   ;;  %v123_v23 = vlaneseq }
  0x35   :  { %v96_v2 = vsel %vm95_vm0, %v1846_v0, 0.0  ;;  %v99_v3 = vsel %vm95_vm0, %v1848_v1, 0.0  ;;  %v1620_v14 = vld [vmem:[#allocation7 + $0x8] sm:$0xff]   ;;  %1450 = vmatprep.subr.bf16.mxu0 %v1786_v15  ;;  %vm1787_vm1 = vmmov 0   ;;  %v1621_v16 = vld [vmem:[#allocation7] sm:$0xff]   ;;  %1458 = vmatprep.subr.bf16.mxu1 %v1786_v15  ;;  %v1869_v26 = vld [vmem:[#allocation8] sm:$0xff] }
  0x36   :  { %97 = vadd.xlane.f32.xlu0 %v96_v2  ;;  %1454 = vmatprep.mubr.msk.bf16.mxu0 %vm1787_vm1, %v1786_v15  ;;  %v1866_v24 = vshrl.u32 %v123_v23, 7  ;;  %s1788_s2 = smov 88   ;;  %s1789_s3 = smov 96   ;;  %vm201_vm2 = vcmask 64512   ;;  %vm265_vm3 = vcmask 1043456   ;;  %vm652_vm4 = vcmask 130048  }
  0x37   :  { %1451 = vmatpush3.bf16.msra.mxu0 %v1620_v14  ;;  %1460 = vmatprep.mubr.msk.bf16.mxu1 %vm1787_vm1, %v1786_v15  ;;  %s1790_s11 = smov 120   ;;  %s1791_s12 = smov 112   ;;  %vm654_vm5 = vcmask 195584   ;;  %vm1306_vm6 = vcmask 523264  }
  0x38   :  { %1452 = vmatprep.subr.bf16.mxu0 %v1786_v15  ;;  %v125_v25 = vsub.s32 0, %v1866_v24  ;;  %v131_v30 = vsub.s32 1, %v1866_v24  ;;  %v138_v39 = vsub.s32 4, %v1866_v24  ;;  %s1792_s13 = smov 80   ;;  %s1793_s14 = smov 104  }
  0x39   :  { %s1794_s15 = smov 72   ;;  %s1795_s16 = smov 56  }
  0x3a   :  { %100 = vadd.xlane.f32.xlu0 %v99_v3  ;;  %v126_v29 = vrot.slane %v1869_v26, %v125_v25  ;;  %v132_v34 = vrot.slane %v1869_v26, %v131_v30  ;;  %v139_v40 = vrot.slane %v1869_v26, %v138_v39  ;;  %s1796_s17 = smov 48   ;;  %s1797_s18 = smov 40  }
  0x3b   :  { %1453 = vmatpush3.bf16.msra.mxu0 %v1621_v16  ;;  %s1798_s19 = smov 16   ;;  %s1799_s22 = smov 24  }
  0x3c   :  { %1464 = vmatprep.subr.bf16.mxu0 %v1786_v15  ;;  %s1800_s23 = smov [#allocation10]  }
  0x3d   :  { %s1360_s24 = sshll.u32 %s1800_s23, 4  ;;  %s1361_s24 = int_to_ptr.vmem [resolvable:$true] %s1360_s24 }
  0x3e   :  { %s1750_s25 = scalar_lea.vmem %s1361_s24, 256  ;;  %p1755_p7 = scmp.lt.s32.totalorder %s1361_s24, %s1361_s24 }
  0x3f   :  { %p1751_p6 = scmp.ne.s32.totalorder %s1361_s24, %s1750_s25  ;;  %p1756_p8 = scmp.lt.s32.totalorder %s1750_s25, %s1750_s25 }
  0x41   :  { %p1757_p9 = por %p1756_p8, %p1755_p7 }
  0x43   :  { %p1758_p10 = pnand %p1757_p9, %p1751_p6 }
  0xbf   :  { %v98_v4 = vpop.xlane.xlu0 %97 }
  0xc0   :  { %v103_v5 = vmul.f32 0.03125, %v98_v4 }
  0xc2   :  { %v105_v6 = vsub.f32 %v1846_v0, %v103_v5 }
  0xc3   :  { %v101_v7 = vpop.xlane.xlu0 %100 }
  0xc4   :  { %v104_v8 = vmul.f32 0.03125, %v101_v7  ;;  %v107_v9 = vmul.f32 %v105_v6, %v105_v6 }
  0xc6   :  { %v106_v10 = vsub.f32 %v1848_v1, %v104_v8  ;;  %v109_v11 = vsel %vm95_vm0, %v107_v9, 0.0  ;;  %v196_v9 = vld [vmem:[#allocation5] sm:$0xff] }
  0xc7   :  { %110 = vadd.xlane.f32.xlu1 %v109_v11 }
  0xc8   :  { %v108_v12 = vmul.f32 %v106_v10, %v106_v10 }
  0xca   :  { %v112_v13 = vsel %vm95_vm0, %v108_v12, 0.0 }
  0xcb   :  { %113 = vadd.xlane.f32.xlu1 %v112_v13 }
 0x150   :  { %v111_v17 = vpop.xlane.xlu1 %110 }
 0x151   :  { %v115_v18 = vmul.f32 0.03125, %v111_v17 }
 0x153   :  { %v117_v19 = vadd.f32 1e-05, %v115_v18 }
 0x154   :  { %v114_v20 = vpop.xlane.xlu1 %113 }
 0x155   :  { %1630 = vrsqrt.f32 %v117_v19  ;;  %v116_v21 = vmul.f32 0.03125, %v114_v20 }
 0x157   :  { %v118_v22 = vadd.f32 1e-05, %v116_v21 }
 0x159   :  { %1632 = vrsqrt.f32 %v118_v22 }
 0x162   :  { %v1631_v27 = vpop.eup %1630 }
 0x163   :  { %v121_v28 = vmul.f32 %v1631_v27, %v105_v6 }
 0x165   :  { %v127_v33 = vmul.f32 %v126_v29, %v121_v28 }
 0x166   :  { %v1633_v31 = vpop.eup %1632 }
 0x167   :  { %v122_v32 = vmul.f32 %v1633_v31, %v106_v10  ;;  %v133_v36 = vadd.f32 %v132_v34, %v127_v33 }
 0x169   :  { %v128_v35 = vmul.f32 %v126_v29, %v122_v32 }
 0x16b   :  { %v134_v37 = vadd.f32 %v132_v34, %v128_v35 }
 0x16d   :  { %v135_v38 = vpack.c.bf16 %v134_v37, %v133_v36 }
 0x16f   :  { %1455 = vmatmul.mubr.msk.bf16.vlgmr.msra.gmra.mxu0 %vm95_vm0, %v135_v38 }
 0x170   :  { %1466 = vmatprep.mubr.msk.bf16.mxu0 %vm1787_vm1, %v1786_v15 }
 0x22f   :  { %v189_v41 = vpop.f32.mrf.mxu0 }
 0x230   :  { %v190_v42 = vadd.f32 %v189_v41, %v139_v40 }
 0x231   :  { %v1456_v43 = vpop.f32.mrf.mxu0 }
 0x232   :  { %v1879_v44 = vpack.c.bf16 %v190_v42, %v190_v42 }
 0x233   :  { %v192_v45 = vpop.f32.mrf.mxu0 }
 0x234   :  { %311 = vrot.lane.b32.xlu1 %v1879_v44, %s1788_s2  ;;  %199 = vrot.lane.b32.xlu0 %v1879_v44, %s1789_s3  ;;  %v193_v47 = vadd.f32 %v192_v45, %v139_v40 }
 0x235   :  { %v1457_v46 = vpop.f32.mrf.mxu0 }
 0x236   :  { %v1887_v48 = vpack.c.bf16 %v193_v47, %v193_v47 }
 0x238   :  { %309 = vrot.lane.b32.xlu1 %v1879_v44, %s1790_s11  ;;  %419 = vrot.lane.b32.xlu0 %v1879_v44, %s1791_s12 }
 0x23c   :  { %421 = vrot.lane.b32.xlu1 %v1879_v44, %s1792_s13  ;;  %529 = vrot.lane.b32.xlu0 %v1879_v44, %s1793_s14 }
 0x240   :  { %531 = vrot.lane.b32.xlu1 %v1879_v44, %s1794_s15  ;;  %770 = vrot.lane.b32.xlu0 %v1887_v48, %s1788_s2 }
 0x244   :  { %880 = vrot.lane.b32.xlu0 %v1887_v48, %s1792_s13  ;;  %660 = vrot.lane.b32.xlu1 %v1887_v48, %s1789_s3 }
 0x248   :  { %990 = vrot.lane.b32.xlu0 %v1887_v48, %s1794_s15  ;;  %768 = vrot.lane.b32.xlu1 %v1887_v48, %s1790_s11 }
 0x24c   :  { %878 = vrot.lane.b32.xlu1 %v1887_v48, %s1791_s12 }
 0x250   :  { %988 = vrot.lane.b32.xlu1 %v1887_v48, %s1793_s14 }
 0x2a6   :  { %v200_v49 = vpop.permute.xlu0 %199  ;;  %v312_v51 = vpop.permute.xlu1 %311 }
 0x2a7   :  { %v206_v50 = vsel %vm201_vm2, %v200_v49, 0  ;;  %v317_v53 = vsel %vm201_vm2, %v312_v51, 0  ;;  %v657_v51 = vld [vmem:[#allocation5 + $0x8] sm:$0xff] }
 0x2a8   :  { %1459 = vmatpush3.bf16.xpose.msra.mxu1 %v206_v50 }
 0x2a9   :  { %1470 = vmatprep.subr.bf16.mxu1 %v1786_v15 }
 0x2aa   :  { %v310_v52 = vpop.permute.xlu1 %309  ;;  %v420_v57 = vpop.permute.xlu0 %419 }
 0x2ae   :  { %v422_v54 = vpop.permute.xlu1 %421  ;;  %v530_v60 = vpop.permute.xlu0 %529 }
 0x2af   :  { %1461 = vmatmul.mubr.msk.bf16.vlgmr.msra.gmra.mxu1 %vm201_vm2, %v1879_v44  ;;  %v427_v55 = vsel %vm201_vm2, %v422_v54, 0 }
 0x2b0   :  { %1471 = vmatpush3.bf16.xpose.msra.mxu1 %v317_v53  ;;  %1472 = vmatprep.mubr.msk.bf16.mxu1 %vm1787_vm1, %v1786_v15 }
 0x2b1   :  { %1482 = vmatprep.subr.bf16.mxu1 %v1786_v15 }
 0x2b2   :  { %v532_v56 = vpop.permute.xlu1 %531  ;;  %v771_v62 = vpop.permute.xlu0 %770 }
 0x2b3   :  { %v537_v58 = vsel %vm201_vm2, %v532_v56, 0  ;;  %v776_v63 = vsel %vm201_vm2, %v771_v62, 0 }
 0x2b6   :  { %v661_v59 = vpop.permute.xlu1 %660  ;;  %v881_v2 = vpop.permute.xlu0 %880 }
 0x2b7   :  { %1473 = vmatmul.mubr.msk.bf16.vlgmr.msra.gmra.mxu1 %vm201_vm2, %v310_v52  ;;  %v666_v61 = vsel %vm201_vm2, %v661_v59, 0  ;;  %v886_v4 = vsel %vm201_vm2, %v881_v2, 0 }
 0x2b8   :  { %1483 = vmatpush3.bf16.xpose.msra.mxu1 %v427_v55  ;;  %1484 = vmatprep.mubr.msk.bf16.mxu1 %vm1787_vm1, %v1786_v15 }
 0x2b9   :  { %1494 = vmatprep.subr.bf16.mxu1 %v1786_v15 }
 0x2ba   :  { %v769_v3 = vpop.permute.xlu1 %768  ;;  %v991_v5 = vpop.permute.xlu0 %990 }
 0x2bb   :  { %v996_v7 = vsel %vm201_vm2, %v991_v5, 0 }
 0x2be   :  { %v879_v6 = vpop.permute.xlu1 %878 }
 0x2bf   :  { %1485 = vmatmul.mubr.msk.bf16.vlgmr.msra.gmra.mxu1 %vm201_vm2, %v420_v57 }
 0x2c0   :  { %1495 = vmatpush3.bf16.xpose.msra.mxu1 %v537_v58  ;;  %1496 = vmatprep.mubr.msk.bf16.mxu1 %vm1787_vm1, %v1786_v15 }
 0x2c1   :  { %1506 = vmatprep.subr.bf16.mxu1 %v1786_v15 }
 0x2c2   :  { %v989_v8 = vpop.permute.xlu1 %988 }
 0x2c7   :  { %1497 = vmatmul.mubr.msk.bf16.vlgmr.msra.gmra.mxu1 %vm201_vm2, %v530_v60 }
 0x2c8   :  { %1507 = vmatpush3.bf16.xpose.msra.mxu1 %v666_v61  ;;  %1508 = vmatprep.mubr.msk.bf16.mxu1 %vm1787_vm1, %v1786_v15 }
 0x2c9   :  { %1518 = vmatprep.subr.bf16.mxu1 %v1786_v15 }
 0x2cf   :  { %1509 = vmatmul.mubr.msk.bf16.vlgmr.msra.gmra.mxu1 %vm201_vm2, %v1887_v48 }
 0x2d0   :  { %1519 = vmatpush3.bf16.xpose.msra.mxu1 %v776_v63  ;;  %1520 = vmatprep.mubr.msk.bf16.mxu1 %vm1787_vm1, %v1786_v15 }
 0x2d1   :  { %1530 = vmatprep.subr.bf16.mxu1 %v1786_v15 }
 0x2d7   :  { %1521 = vmatmul.mubr.msk.bf16.vlgmr.msra.gmra.mxu1 %vm201_vm2, %v769_v3 }
 0x2d8   :  { %1531 = vmatpush3.bf16.xpose.msra.mxu1 %v886_v4  ;;  %1532 = vmatprep.mubr.msk.bf16.mxu1 %vm1787_vm1, %v1786_v15 }
 0x2d9   :  { %1542 = vmatprep.subr.bf16.mxu1 %v1786_v15 }
 0x2df   :  { %1533 = vmatmul.mubr.msk.bf16.vlgmr.msra.gmra.mxu1 %vm201_vm2, %v879_v6 }
 0x2e0   :  { %1543 = vmatpush3.bf16.xpose.msra.mxu1 %v996_v7  ;;  %1544 = vmatprep.mubr.msk.bf16.mxu1 %vm1787_vm1, %v1786_v15 }
 0x2e1   :  { %1554 = vmatprep.subr.bf16.mxu1 %v1786_v15 }
 0x2e7   :  { %1545 = vmatmul.mubr.msk.bf16.vlgmr.msra.gmra.mxu1 %vm201_vm2, %v989_v8 }
 0x2e8   :  { %1558 = vmatprep.mubr.msk.bf16.mxu1 %vm1787_vm1, %v1786_v15 }
 0x36f   :  { %v242_v10 = vpop.f32.mrf.mxu1 }
 0x370   :  { %v1939_v11 = vadd.f32 %v242_v10, %v196_v9 }
 0x371   :  { %v1462_v12 = vpop.f32.mrf.mxu1 }
 0x372   :  { %v248_v13 = vsel %vm201_vm2, %v1939_v11, -inf }
 0x373   :  { %v245_v14 = vpop.f32.mrf.mxu1  ;;  %249 = vmax.xlane.f32.xlu0 %v248_v13 }
 0x375   :  { %v1463_v16 = vpop.f32.mrf.mxu1 }
 0x377   :  { %v353_v17 = vpop.f32.mrf.mxu1 }
 0x378   :  { %v1943_v18 = vadd.f32 %v353_v17, %v196_v9 }
 0x379   :  { %v1474_v19 = vpop.f32.mrf.mxu1 }
 0x37a   :  { %v359_v20 = vsel %vm201_vm2, %v1943_v18, -inf }
 0x37b   :  { %v356_v21 = vpop.f32.mrf.mxu1  ;;  %360 = vmax.xlane.f32.xlu1 %v359_v20 }
 0x37d   :  { %v1475_v22 = vpop.f32.mrf.mxu1 }
 0x37f   :  { %v463_v23 = vpop.f32.mrf.mxu1 }
 0x380   :  { %v464_v43 = vadd.f32 %v463_v23, %v196_v9 }
 0x381   :  { %v1486_v25 = vpop.f32.mrf.mxu1 }
 0x382   :  { %v469_v50 = vsel %vm201_vm2, %v464_v43, -inf }
 0x383   :  { %v466_v27 = vpop.f32.mrf.mxu1 }
 0x385   :  { %v1487_v28 = vpop.f32.mrf.mxu1 }
 0x387   :  { %v573_v29 = vpop.f32.mrf.mxu1 }
 0x388   :  { %v574_v47 = vadd.f32 %v573_v29, %v196_v9 }
 0x389   :  { %v1498_v30 = vpop.f32.mrf.mxu1  ;;  %260 = vrot.lane.b32.xlu0 %v1879_v44, %s1783_s1 }
 0x38a   :  { %v579_v56 = vsel %vm201_vm2, %v574_v47, -inf }
 0x38b   :  { %v576_v31 = vpop.f32.mrf.mxu1 }
 0x38c   :  { %371 = vrot.lane.b32.xlu1 %v1879_v44, %s1795_s16 }
 0x38d   :  { %v1499_v32 = vpop.f32.mrf.mxu1 }
 0x38f   :  { %v702_v33 = vpop.f32.mrf.mxu1 }
 0x390   :  { %v703_v53 = vadd.f32 %v702_v33, %v657_v51 }
 0x391   :  { %v1510_v34 = vpop.f32.mrf.mxu1 }
 0x392   :  { %v708_v60 = vsel %vm201_vm2, %v703_v53, -inf }
 0x393   :  { %v705_v35 = vpop.f32.mrf.mxu1 }
 0x395   :  { %v1511_v36 = vpop.f32.mrf.mxu1 }
 0x397   :  { %v812_v37 = vpop.f32.mrf.mxu1 }
 0x398   :  { %v813_v54 = vadd.f32 %v812_v37, %v657_v51 }
 0x399   :  { %v1522_v38 = vpop.f32.mrf.mxu1 }
 0x39a   :  { %v818_v61 = vsel %vm201_vm2, %v813_v54, -inf }
 0x39b   :  { %v815_v39 = vpop.f32.mrf.mxu1 }
 0x39d   :  { %v1523_v40 = vpop.f32.mrf.mxu1 }
 0x39f   :  { %v922_v41 = vpop.f32.mrf.mxu1 }
 0x3a0   :  { %v1953_v58 = vadd.f32 %v922_v41, %v657_v51 }
 0x3a1   :  { %v1534_v42 = vpop.f32.mrf.mxu1 }
 0x3a2   :  { %v928_v62 = vsel %vm201_vm2, %v1953_v58, -inf }
 0x3a3   :  { %v925_v45 = vpop.f32.mrf.mxu1 }
 0x3a5   :  { %v1535_v46 = vpop.f32.mrf.mxu1 }
 0x3a7   :  { %v1032_v49 = vpop.f32.mrf.mxu1 }
 0x3a8   :  { %470 = vmax.xlane.f32.xlu0 %v469_v50  ;;  %v1955_v59 = vadd.f32 %v1032_v49, %v657_v51 }
 0x3a9   :  { %v1546_v52 = vpop.f32.mrf.mxu1 }
 0x3aa   :  { %v1038_v63 = vsel %vm201_vm2, %v1955_v59, -inf }
 0x3ab   :  { %v1035_v55 = vpop.f32.mrf.mxu1 }
 0x3ac   :  { %580 = vmax.xlane.f32.xlu0 %v579_v56 }
 0x3ad   :  { %v1547_v57 = vpop.f32.mrf.mxu1 }
 0x3b0   :  { %709 = vmax.xlane.f32.xlu0 %v708_v60  ;;  %819 = vmax.xlane.f32.xlu1 %v818_v61 }
 0x3b4   :  { %929 = vmax.xlane.f32.xlu0 %v928_v62  ;;  %1039 = vmax.xlane.f32.xlu1 %v1038_v63 }
 0x3ca   :  { %481 = vrot.lane.b32.xlu0 %v1879_v44, %s1796_s17 }
 0x3fc   :  { %v250_v2 = vpop.xlane.xlu0 %249 }
 0x3fd   :  { %v251_v3 = vsub.f32 %v1939_v11, %v250_v2 }
 0x3ff   :  { %v252_v4 = vmul.f32 1.442695, %v251_v3 }
 0x400   :  { %v261_v5 = vpop.permute.xlu0 %260 }
 0x401   :  { %1634 = vpow2.f32 %v252_v4  ;;  %v267_v6 = vsel %vm265_vm3, %v261_v5, 0 }
 0x402   :  { %1465 = vmatpush3.bf16.msra.mxu0 %v267_v6 }
 0x403   :  { %1476 = vmatprep.subr.bf16.mxu0 %v1786_v15 }
 0x404   :  { %v361_v7 = vpop.xlane.xlu1 %360 }
 0x405   :  { %v362_v8 = vsub.f32 %v1943_v18, %v361_v7 }
 0x407   :  { %v363_v9 = vmul.f32 1.442695, %v362_v8 }
 0x408   :  { %v372_v19 = vpop.permute.xlu1 %371 }
 0x409   :  { %1636 = vpow2.f32 %v363_v9  ;;  %v377_v55 = vsel %vm265_vm3, %v372_v19, 0 }
 0x40e   :  { %v1635_v10 = vpop.eup %1634 }
 0x40f   :  { %v254_v12 = vsel %vm201_vm2, %v1635_v10, 0.0 }
 0x410   :  { %255 = vadd.xlane.f32.xlu0 %v254_v12 }
 0x416   :  { %v1970_v13 = vpop.eup %1636 }
 0x417   :  { %v365_v11 = vsel %vm201_vm2, %v1970_v13, 0.0 }
 0x418   :  { %366 = vadd.xlane.f32.xlu1 %v365_v11 }
 0x429   :  { %720 = vrot.lane.b32.xlu1 %v1887_v48, %s1783_s1 }
 0x431   :  { %v471_v14 = vpop.xlane.xlu0 %470 }
 0x432   :  { %v472_v16 = vsub.f32 %v464_v43, %v471_v14 }
 0x434   :  { %v473_v17 = vmul.f32 1.442695, %v472_v16 }
 0x435   :  { %v581_v18 = vpop.xlane.xlu0 %580 }
 0x436   :  { %1638 = vpow2.f32 %v473_v17  ;;  %v582_v20 = vsub.f32 %v574_v47, %v581_v18 }
 0x438   :  { %v583_v21 = vmul.f32 1.442695, %v582_v20 }
 0x439   :  { %v710_v22 = vpop.xlane.xlu0 %709  ;;  %v820_v23 = vpop.xlane.xlu1 %819 }
 0x43a   :  { %v711_v25 = vsub.f32 %v703_v53, %v710_v22  ;;  %1640 = vpow2.f32 %v583_v21  ;;  %v821_v28 = vsub.f32 %v813_v54, %v820_v23 }
 0x43c   :  { %v712_v27 = vmul.f32 1.442695, %v711_v25  ;;  %v822_v29 = vmul.f32 1.442695, %v821_v28 }
 0x43d   :  { %v930_v38 = vpop.xlane.xlu0 %929  ;;  %v1040_v41 = vpop.xlane.xlu1 %1039 }
 0x43e   :  { %1642 = vpow2.f32 %v712_v27  ;;  %v931_v39 = vsub.f32 %v1953_v58, %v930_v38  ;;  %v1041_v42 = vsub.f32 %v1955_v59, %v1040_v41 }
 0x43f   :  { %1644 = vpow2.f32 %v822_v29 }
 0x440   :  { %v932_v40 = vmul.f32 1.442695, %v931_v39  ;;  %v1042_v43 = vmul.f32 1.442695, %v1041_v42 }
 0x441   :  { %v482_v49 = vpop.permute.xlu0 %481 }
 0x442   :  { %1646 = vpow2.f32 %v932_v40 }
 0x443   :  { %v1639_v30 = vpop.eup %1638  ;;  %1648 = vpow2.f32 %v1042_v43 }
 0x444   :  { %v475_v31 = vsel %vm201_vm2, %v1639_v30, 0.0 }
 0x445   :  { %476 = vadd.xlane.f32.xlu0 %v475_v31 }
 0x447   :  { %v1977_v32 = vpop.eup %1640 }
 0x448   :  { %v585_v33 = vsel %vm201_vm2, %v1977_v32, 0.0 }
 0x44b   :  { %v1981_v34 = vpop.eup %1642 }
 0x44c   :  { %v714_v35 = vsel %vm201_vm2, %v1981_v34, 0.0  ;;  %v1985_v36 = vpop.eup %1644 }
 0x44d   :  { %586 = vadd.xlane.f32.xlu1 %v585_v33  ;;  %v824_v37 = vsel %vm201_vm2, %v1985_v36, 0.0 }
 0x44f   :  { %v1994_v45 = vpop.eup %1646 }
 0x450   :  { %v934_v46 = vsel %vm201_vm2, %v1994_v45, 0.0 }
 0x451   :  { %715 = vadd.xlane.f32.xlu1 %v714_v35 }
 0x455   :  { %825 = vadd.xlane.f32.xlu1 %v824_v37 }
 0x45b   :  { %591 = vrot.lane.b32.xlu0 %v1879_v44, %s1797_s18  ;;  %v1998_v44 = vpop.eup %1648 }
 0x45c   :  { %v1044_v47 = vsel %vm201_vm2, %v1998_v44, 0.0 }
 0x466   :  { %830 = vrot.lane.b32.xlu1 %v1887_v48, %s1795_s16 }
 0x47a   :  { %935 = vadd.xlane.f32.xlu0 %v934_v46 }
 0x48a   :  { %1045 = vadd.xlane.f32.xlu1 %v1044_v47 }
 0x490   :  { %940 = vrot.lane.b32.xlu0 %v1887_v48, %s1796_s17 }
 0x499   :  { %v256_v50 = vpop.xlane.xlu0 %255 }
 0x49a   :  { %1650 = vrcp.f32 %v256_v50 }
 0x49b   :  { %1050 = vrot.lane.b32.xlu1 %v1887_v48, %s1797_s18  ;;  %v487_v48 = vsel %vm265_vm3, %v482_v49, 0 }
 0x4a1   :  { %v367_v51 = vpop.xlane.xlu1 %366 }
 0x4a2   :  { %1652 = vrcp.f32 %v367_v51 }
 0x4a5   :  { %v721_v60 = vpop.permute.xlu1 %720 }
 0x4a6   :  { %v726_v12 = vsel %vm265_vm3, %v721_v60, 0 }
 0x4a7   :  { %v1651_v52 = vpop.eup %1650 }
 0x4a8   :  { %v258_v53 = vmul.f32 %v1651_v52, %v1635_v10 }
 0x4aa   :  { %v259_v54 = vpack.c.bf16 %v258_v53, %v258_v53 }
 0x4ac   :  { %1467 = vmatmul.mubr.msk.bf16.vlgmr.msra.gmra.mxu0 %vm201_vm2, %v259_v54 }
 0x4ad   :  { %1477 = vmatpush3.bf16.msra.mxu0 %v377_v55  ;;  %1478 = vmatprep.mubr.msk.bf16.mxu0 %vm1787_vm1, %v1786_v15 }
 0x4ae   :  { %1488 = vmatprep.subr.bf16.mxu0 %v1786_v15 }
 0x4af   :  { %v1653_v56 = vpop.eup %1652 }
 0x4b0   :  { %v369_v57 = vmul.f32 %v1653_v56, %v1970_v13 }
 0x4b2   :  { %v370_v58 = vpack.c.bf16 %v369_v57, %v369_v57 }
 0x4b4   :  { %1479 = vmatmul.mubr.msk.bf16.vlgmr.msra.gmra.mxu0 %vm201_vm2, %v370_v58 }
 0x4b5   :  { %1489 = vmatpush3.bf16.msra.mxu0 %v487_v48  ;;  %1490 = vmatprep.mubr.msk.bf16.mxu0 %vm1787_vm1, %v1786_v15 }
 0x4b6   :  { %1500 = vmatprep.subr.bf16.mxu0 %v1786_v15 }
 0x4ce   :  { %v477_v59 = vpop.xlane.xlu0 %476 }
 0x4cf   :  { %1654 = vrcp.f32 %v477_v59  ;;  %v1622_v59 = vld [vmem:[#allocation7 + $0x18] sm:$0xff]  }
 0x4d0   :  { %1555 = vmatpush3.bf16.msra.mxu1 %v1622_v59 }
 0x4d1   :  { %1556 = vmatprep.subr.bf16.mxu1 %v1786_v15 }
 0x4d2   :  { %v592_v3 = vpop.permute.xlu0 %591 }
 0x4d3   :  { %v597_v6 = vsel %vm265_vm3, %v592_v3, 0  ;;  %v1623_v3 = vld [vmem:[#allocation7 + $0x10] sm:$0xff]  }
 0x4d4   :  { %1557 = vmatpush3.bf16.msra.mxu1 %v1623_v3 }
 0x4d5   :  { %1570 = vmatprep.subr.bf16.mxu1 %v1786_v15 }
 0x4d6   :  { %v587_v61 = vpop.xlane.xlu1 %586 }
 0x4d7   :  { %1656 = vrcp.f32 %v587_v61 }
 0x4da   :  { %v716_v62 = vpop.xlane.xlu1 %715 }
 0x4db   :  { %1658 = vrcp.f32 %v716_v62 }
 0x4dc   :  { %v1655_v63 = vpop.eup %1654 }
 0x4dd   :  { %v479_v2 = vmul.f32 %v1655_v63, %v1639_v30 }
 0x4de   :  { %v826_v5 = vpop.xlane.xlu1 %825 }
 0x4df   :  { %v480_v4 = vpack.c.bf16 %v479_v2, %v479_v2  ;;  %1660 = vrcp.f32 %v826_v5 }
 0x4e1   :  { %1491 = vmatmul.mubr.msk.bf16.vlgmr.msra.gmra.mxu0 %vm201_vm2, %v480_v4 }
 0x4e2   :  { %1501 = vmatpush3.bf16.msra.mxu0 %v597_v6  ;;  %1502 = vmatprep.mubr.msk.bf16.mxu0 %vm1787_vm1, %v1786_v15  ;;  %v831_v11 = vpop.permute.xlu1 %830 }
 0x4e3   :  { %1512 = vmatprep.subr.bf16.mxu0 %v1786_v15  ;;  %v836_v17 = vsel %vm265_vm3, %v831_v11, 0 }
 0x4e4   :  { %v1657_v7 = vpop.eup %1656 }
 0x4e5   :  { %v589_v8 = vmul.f32 %v1657_v7, %v1977_v32 }
 0x4e7   :  { %v590_v9 = vpack.c.bf16 %v589_v8, %v589_v8 }
 0x4e8   :  { %v1659_v10 = vpop.eup %1658 }
 0x4e9   :  { %1503 = vmatmul.mubr.msk.bf16.vlgmr.msra.gmra.mxu0 %vm201_vm2, %v590_v9  ;;  %v718_v13 = vmul.f32 %v1659_v10, %v1981_v34 }
 0x4ea   :  { %1513 = vmatpush3.bf16.msra.mxu0 %v726_v12  ;;  %1514 = vmatprep.mubr.msk.bf16.mxu0 %vm1787_vm1, %v1786_v15 }
 0x4eb   :  { %1524 = vmatprep.subr.bf16.mxu0 %v1786_v15  ;;  %v719_v14 = vpack.c.bf16 %v718_v13, %v718_v13 }
 0x4ec   :  { %v1661_v16 = vpop.eup %1660 }
 0x4ed   :  { %v828_v19 = vmul.f32 %v1661_v16, %v1985_v36 }
 0x4ef   :  { %v829_v18 = vpack.c.bf16 %v828_v19, %v828_v19 }
 0x4f1   :  { %1515 = vmatmul.mubr.msk.bf16.vlgmr.msra.gmra.mxu0 %vm201_vm2, %v719_v14 }
 0x4f2   :  { %1525 = vmatpush3.bf16.msra.mxu0 %v836_v17  ;;  %1526 = vmatprep.mubr.msk.bf16.mxu0 %vm1787_vm1, %v1786_v15 }
 0x4f3   :  { %1536 = vmatprep.subr.bf16.mxu0 %v1786_v15 }
 0x4f9   :  { %1527 = vmatmul.mubr.msk.bf16.vlgmr.msra.gmra.mxu0 %vm201_vm2, %v829_v18 }
 0x4fa   :  { %1538 = vmatprep.mubr.msk.bf16.mxu0 %vm1787_vm1, %v1786_v15 }
 0x503   :  { %v936_v20 = vpop.xlane.xlu0 %935 }
 0x504   :  { %1662 = vrcp.f32 %v936_v20 }
 0x507   :  { %v941_v21 = vpop.permute.xlu0 %940 }
 0x508   :  { %v946_v22 = vsel %vm265_vm3, %v941_v21, 0 }
 0x509   :  { %1537 = vmatpush3.bf16.msra.mxu0 %v946_v22 }
 0x50a   :  { %1548 = vmatprep.subr.bf16.mxu0 %v1786_v15 }
 0x511   :  { %v1663_v23 = vpop.eup %1662 }
 0x512   :  { %v938_v25 = vmul.f32 %v1663_v23, %v1994_v45 }
 0x513   :  { %v1046_v27 = vpop.xlane.xlu1 %1045 }
 0x514   :  { %1664 = vrcp.f32 %v1046_v27  ;;  %v939_v28 = vpack.c.bf16 %v938_v25, %v938_v25 }
 0x516   :  { %1539 = vmatmul.mubr.msk.bf16.vlgmr.msra.gmra.mxu0 %vm201_vm2, %v939_v28  ;;  %v1116_v28 = vsub.s32 5, %v1866_v24 }
 0x517   :  { %v1051_v29 = vpop.permute.xlu1 %1050  ;;  %1550 = vmatprep.mubr.msk.bf16.mxu0 %vm1787_vm1, %v1786_v15 }
 0x518   :  { %v1056_v30 = vsel %vm265_vm3, %v1051_v29, 0  ;;  %v1117_v29 = vrot.slane %v1869_v26, %v1116_v28 }
 0x519   :  { %1549 = vmatpush3.bf16.msra.mxu0 %v1056_v30 }
 0x51a   :  { %1562 = vmatprep.subr.bf16.mxu0 %v1786_v15 }
 0x521   :  { %v1665_v31 = vpop.eup %1664 }
 0x522   :  { %v1048_v32 = vmul.f32 %v1665_v31, %v1998_v44 }
 0x524   :  { %v1049_v33 = vpack.c.bf16 %v1048_v32, %v1048_v32 }
 0x526   :  { %1551 = vmatmul.mubr.msk.bf16.vlgmr.msra.gmra.mxu0 %vm201_vm2, %v1049_v33 }
 0x527   :  { %1566 = vmatprep.mubr.msk.bf16.mxu0 %vm1787_vm1, %v1786_v15 }
 0x56c   :  { %v303_v34 = vpop.f32.mrf.mxu0 }
 0x56e   :  { %v1468_v35 = vpop.f32.mrf.mxu0 }
 0x570   :  { %v306_v36 = vpop.f32.mrf.mxu0 }
 0x572   :  { %v1469_v37 = vpop.f32.mrf.mxu0 }
 0x574   :  { %v413_v38 = vpop.f32.mrf.mxu0 }
 0x576   :  { %v1480_v39 = vpop.f32.mrf.mxu0 }
 0x578   :  { %v416_v40 = vpop.f32.mrf.mxu0 }
 0x57a   :  { %v1481_v41 = vpop.f32.mrf.mxu0 }
 0x5a1   :  { %v523_v42 = vpop.f32.mrf.mxu0 }
 0x5a3   :  { %v1492_v43 = vpop.f32.mrf.mxu0 }
 0x5a5   :  { %v526_v45 = vpop.f32.mrf.mxu0 }
 0x5a7   :  { %v1493_v46 = vpop.f32.mrf.mxu0 }
 0x5a9   :  { %v633_v47 = vpop.f32.mrf.mxu0 }
 0x5ab   :  { %v1504_v44 = vpop.f32.mrf.mxu0 }
 0x5ad   :  { %v636_v49 = vpop.f32.mrf.mxu0 }
 0x5ae   :  { %v1624_v49 = vld [vmem:[#allocation7 + $0x28] sm:$0xff]  }
 0x5af   :  { %v1505_v50 = vpop.f32.mrf.mxu0  ;;  %1563 = vmatpush3.bf16.msra.mxu0 %v1624_v49 }
 0x5b0   :  { %v1625_v50 = vld [vmem:[#allocation7 + $0x20] sm:$0xff]   ;;  %1564 = vmatprep.subr.bf16.mxu0 %v1786_v15 }
 0x5b1   :  { %v762_v51 = vpop.f32.mrf.mxu0 }
 0x5b3   :  { %v1516_v52 = vpop.f32.mrf.mxu0  ;;  %1565 = vmatpush3.bf16.msra.mxu0 %v1625_v50 }
 0x5b5   :  { %v765_v53 = vpop.f32.mrf.mxu0 }
 0x5b7   :  { %v1517_v54 = vpop.f32.mrf.mxu0 }
 0x5b9   :  { %v872_v55 = vpop.f32.mrf.mxu0 }
 0x5ba   :  { %v1605_v56 = vpack.i.bf16 %v872_v55, %v413_v38 }
 0x5bb   :  { %v1528_v57 = vpop.f32.mrf.mxu0 }
 0x5bc   :  { %1606 = vrot.lane.b32.xlu0 %v1605_v56, %s1781_s21 }
 0x5bd   :  { %v875_v58 = vpop.f32.mrf.mxu0 }
 0x5be   :  { %v1204_v58 = vsub.s32 2, %v1866_v24 }
 0x5bf   :  { %v1529_v48 = vpop.f32.mrf.mxu0 }
 0x5d6   :  { %v982_v60 = vpop.f32.mrf.mxu0 }
 0x5d7   :  { %v1610_v61 = vpack.i.bf16 %v982_v60, %v523_v42  ;;  %v1205_v60 = vrot.slane %v1869_v26, %v1204_v58 }
 0x5d8   :  { %v1540_v62 = vpop.f32.mrf.mxu0 }
 0x5d9   :  { %1611 = vrot.lane.b32.xlu1 %v1610_v61, %s1798_s19  ;;  %v1210_v61 = vsub.s32 3, %v1866_v24 }
 0x5da   :  { %v985_v63 = vpop.f32.mrf.mxu0 }
 0x5db   :  { %v1211_v3 = vrot.slane %v1869_v26, %v1210_v61 }
 0x5dc   :  { %v1541_v2 = vpop.f32.mrf.mxu0 }
 0x5e6   :  { %v1092_v4 = vpop.f32.mrf.mxu0 }
 0x5e7   :  { %v1615_v5 = vpack.i.bf16 %v1092_v4, %v633_v47 }
 0x5e8   :  { %v1552_v6 = vpop.f32.mrf.mxu0 }
 0x5e9   :  { %1616 = vrot.lane.b32.xlu0 %v1615_v5, %s1799_s22 }
 0x5ea   :  { %v1095_v7 = vpop.f32.mrf.mxu0 }
 0x5ec   :  { %v1553_v8 = vpop.f32.mrf.mxu0 }
 0x5ed   :  { %v1627_v8 = vld [vmem:[#allocation7 + $0x40] sm:$0xff]  }
 0x62e   :  { %v1607_v9 = vpop.permute.xlu0 %1606 }
 0x62f   :  { %v1609_v12 = vunpack.i.h.bf16 %v1607_v9  ;;  %v1608_v13 = vunpack.i.l.bf16 %v1607_v9  ;;  %v1628_v9 = vld [vmem:[#allocation7 + $0x38] sm:$0xff]  }
 0x631   :  { %v1110_v17 = vsel %vm201_vm2, %v762_v51, %v1609_v12  ;;  %v651_v19 = vsel %vm201_vm2, %v303_v34, %v1608_v13  ;;  %v1626_v51 = vld [vmem:[#allocation7 + $0x48] sm:$0xff]   ;;  %v1217_v12 = vsub.s32 6, %v1866_v24 }
 0x633   :  { %v1218_v13 = vrot.slane %v1869_v26, %v1217_v12 }
 0x64b   :  { %v1612_v10 = vpop.permute.xlu1 %1611 }
 0x64c   :  { %v1614_v11 = vunpack.i.h.bf16 %v1612_v10  ;;  %v1613_v14 = vunpack.i.l.bf16 %v1612_v10  ;;  %v1629_v10 = vld [vmem:[#allocation7 + $0x30] sm:$0xff]  }
 0x64e   :  { %v1111_v21 = vsel %vm652_vm4, %v1110_v17, %v1614_v11  ;;  %v653_v22 = vsel %vm652_vm4, %v651_v19, %v1613_v14 }
 0x65b   :  { %v1617_v16 = vpop.permute.xlu0 %1616 }
 0x65c   :  { %v1619_v18 = vunpack.i.h.bf16 %v1617_v16  ;;  %v1618_v20 = vunpack.i.l.bf16 %v1617_v16 }
 0x65e   :  { %v1112_v23 = vsel %vm654_vm5, %v1111_v21, %v1619_v18  ;;  %v655_v25 = vsel %vm654_vm5, %v653_v22, %v1618_v20 }
 0x65f   :  { %v1113_v27 = vpack.c.bf16 %v1112_v23, %v655_v25  ;;  %v1280_v23 = vsub.s32 7, %v1866_v24 }
 0x661   :  { %1559 = vmatmul.mubr.msk.bf16.vlgmr.msra.gmra.mxu1 %vm95_vm0, %v1113_v27 }
 0x662   :  { %1578 = vmatprep.mubr.msk.bf16.mxu1 %vm1787_vm1, %v1786_v15  ;;  %1571 = vmatpush3.bf16.msra.mxu1 %v1626_v51 }
 0x663   :  { %1572 = vmatprep.subr.bf16.mxu1 %v1786_v15 }
 0x666   :  { %1573 = vmatpush3.bf16.msra.mxu1 %v1627_v8 }
 0x667   :  { %1574 = vmatprep.subr.bf16.mxu1 %v1786_v15 }
 0x66a   :  { %1575 = vmatpush3.bf16.msra.mxu1 %v1628_v9 }
 0x66b   :  { %1576 = vmatprep.subr.bf16.mxu1 %v1786_v15  ;;  %v1281_v15 = vrot.slane %v1869_v26, %v1280_v23 }
 0x66e   :  { %1577 = vmatpush3.bf16.msra.mxu1 %v1629_v10 }
 0x721   :  { %v1167_v30 = vpop.f32.mrf.mxu1 }
 0x722   :  { %v1168_v31 = vadd.f32 %v1167_v30, %v1117_v29 }
 0x723   :  { %v1560_v32 = vpop.f32.mrf.mxu1 }
 0x724   :  { %v2060_v33 = vadd.f32 %v1168_v31, %v1846_v0 }
 0x725   :  { %v1170_v34 = vpop.f32.mrf.mxu1 }
 0x726   :  { %v1171_v35 = vadd.f32 %v1170_v34, %v1117_v29  ;;  %v1176_v36 = vsel %vm95_vm0, %v2060_v33, 0.0 }
 0x727   :  { %1177 = vadd.xlane.f32.xlu1 %v1176_v36  ;;  %v1561_v37 = vpop.f32.mrf.mxu1 }
 0x728   :  { %v2065_v38 = vadd.f32 %v1171_v35, %v1848_v1 }
 0x72a   :  { %v1179_v39 = vsel %vm95_vm0, %v2065_v38, 0.0 }
 0x72b   :  { %1180 = vadd.xlane.f32.xlu0 %v1179_v39 }
 0x7b0   :  { %v1178_v40 = vpop.xlane.xlu1 %1177 }
 0x7b1   :  { %v1182_v41 = vmul.f32 0.03125, %v1178_v40 }
 0x7b3   :  { %v1184_v42 = vsub.f32 %v2060_v33, %v1182_v41 }
 0x7b4   :  { %v1181_v0 = vpop.xlane.xlu0 %1180 }
 0x7b5   :  { %v1183_v43 = vmul.f32 0.03125, %v1181_v0  ;;  %v1186_v45 = vmul.f32 %v1184_v42, %v1184_v42 }
 0x7b7   :  { %v1185_v46 = vsub.f32 %v2065_v38, %v1183_v43  ;;  %v1188_v47 = vsel %vm95_vm0, %v1186_v45, 0.0 }
 0x7b8   :  { %1189 = vadd.xlane.f32.xlu0 %v1188_v47 }
 0x7b9   :  { %v1187_v44 = vmul.f32 %v1185_v46, %v1185_v46 }
 0x7bb   :  { %v1191_v1 = vsel %vm95_vm0, %v1187_v44, 0.0 }
 0x7bc   :  { %1192 = vadd.xlane.f32.xlu0 %v1191_v1 }
 0x841   :  { %v1190_v52 = vpop.xlane.xlu0 %1189 }
 0x842   :  { %v1194_v53 = vmul.f32 0.03125, %v1190_v52 }
 0x844   :  { %v1196_v54 = vadd.f32 1e-05, %v1194_v53 }
 0x845   :  { %v1193_v55 = vpop.xlane.xlu0 %1192 }
 0x846   :  { %1666 = vrsqrt.f32 %v1196_v54  ;;  %v1195_v56 = vmul.f32 0.03125, %v1193_v55 }
 0x848   :  { %v1197_v57 = vadd.f32 1e-05, %v1195_v56 }
 0x84a   :  { %1668 = vrsqrt.f32 %v1197_v57 }
 0x853   :  { %v1667_v48 = vpop.eup %1666 }
 0x854   :  { %v1200_v59 = vmul.f32 %v1667_v48, %v1184_v42 }
 0x856   :  { %v1206_v2 = vmul.f32 %v1205_v60, %v1200_v59 }
 0x857   :  { %v1669_v62 = vpop.eup %1668 }
 0x858   :  { %v1201_v63 = vmul.f32 %v1669_v62, %v1185_v46  ;;  %v1212_v5 = vadd.f32 %v1211_v3, %v1206_v2 }
 0x85a   :  { %v1207_v4 = vmul.f32 %v1205_v60, %v1201_v63 }
 0x85c   :  { %v1213_v6 = vadd.f32 %v1211_v3, %v1207_v4 }
 0x85e   :  { %v1214_v7 = vpack.c.bf16 %v1213_v6, %v1212_v5 }
 0x860   :  { %1567 = vmatmul.mubr.msk.bf16.vlgmr.msra.gmra.mxu0 %vm95_vm0, %v1214_v7 }
 0x920   :  { %v1268_v11 = vpop.f32.mrf.mxu0 }
 0x921   :  { %v1269_v16 = vadd.f32 %v1268_v11, %v1218_v13 }
 0x922   :  { %v1568_v14 = vpop.f32.mrf.mxu0 }
 0x923   :  { %v1275_v20 = vmax.f32 %v1269_v16, 0.0 }
 0x924   :  { %v1271_v17 = vpop.f32.mrf.mxu0 }
 0x925   :  { %v1272_v19 = vadd.f32 %v1271_v17, %v1218_v13 }
 0x926   :  { %v1569_v18 = vpop.f32.mrf.mxu0 }
 0x927   :  { %v1276_v21 = vmax.f32 %v1272_v19, 0.0 }
 0x929   :  { %v1277_v22 = vpack.c.bf16 %v1276_v21, %v1275_v20 }
 0x92b   :  { %1579 = vmatmul.mubr.msk.bf16.vlgmr.msra.gmra.mxu1 %vm1306_vm6, %v1277_v22 }
 0x9eb   :  { %v1344_v25 = vpop.f32.mrf.mxu1 }
 0x9ec   :  { %v1345_v27 = vadd.f32 %v1344_v25, %v1281_v15 }
 0x9ed   :  { %v1580_v28 = vpop.f32.mrf.mxu1 }
 0x9ee   :  { %v1351_v29 = vadd.f32 %v1345_v27, %v2060_v33 }
 0x9ef   :  { %v1347_v30 = vpop.f32.mrf.mxu1 }
 0x9f0   :  { %1353 = vst.msk [vmem:[#allocation10] sm:$0xff] %vm95_vm0, %v1351_v29  ;;  %v1348_v31 = vadd.f32 %v1347_v30, %v1281_v15 }
 0x9f1   :  { %v1581_v32 = vpop.f32.mrf.mxu1 }
 0x9f2   :  { %v1352_v34 = vadd.f32 %v1348_v31, %v2065_v38 }
 0x9f4   :  { %1354 = vst.msk [vmem:[#allocation10 + $0x8] sm:$0xff] %vm95_vm0, %v1352_v34 }
 0x9f5   :  { %1761 = shalt.err (!%p1758_p10)
}
 0x9f6   :  { %1366 = dma.vmem_to_hbm [thread:$0]  %s1361_s24, 256, %s2100_s4, [#allocation4], %s1780_s20, %s1780_s20, %s1781_s21  }
 0x9f7   :  { %1776 = dma.done.wait [#allocation4], 256  }
 0x9f8   :  { %1777 = vsyncadd [#allocation4], 4294967040 }
 0x9f9   :  { %1370 = vsyncpa [#allocation3], 1 }
 0x9fa   :  { %1371 = vsyncpa [#allocation6], 1 }
 0x9fb   :  { %1372 = vsyncpa [#allocation9], 1 }
 0x9fc   :  { %1373 = vsyncpa [#allocation4], 1 }

</bundles_post_ra>
